<compile_context>
chip_gen: v7x
topology: tpu7x:2x2x1
jax: 0.10.0
libtpu: 0.0.40
codegen_flags: <defaults>
</compile_context>

<pallas_src>
import jax
import jax.numpy as jnp
from jax.experimental import pallas as pl
from jax.experimental.pallas import tpu as pltpu

# Layer sizes from the PyTorch module (cls = input feature count).
CLS = 16
LAYER_DIMS = [CLS, 128, 128, 64, 64, 32, 32, 16, 1]
TILE_B = 512  # batch rows per grid step (sweet spot 256-1024, multiple of 128)


def mlp_kernel(x_ref,
               w1, b1, w12, b12, w2, b2, w3, b3,
               w11, b11, w4, b4, w6, b6, w7, b7,
               o_ref):
    """Activations are [feat, TILE_B]; weights are [out, in] bf16; biases [out,1] f32."""

    def linear(h_bf16, w_ref, b_ref):
        # bf16 x bf16 -> f32 accumulation on the MXU.
        return jnp.dot(w_ref[...], h_bf16,
                       preferred_element_type=jnp.float32) + b_ref[...]

    def relu_layer(h_f32, w_ref, b_ref):
        return jnp.maximum(linear(h_f32.astype(jnp.bfloat16), w_ref, b_ref), 0.0)

    h = x_ref[...]                                   # [CLS, TILE_B] bf16 (x.float() -> bf16 feed)
    h = jnp.maximum(linear(h, w1, b1), 0.0)          # fc1 + relu (+ dropout = id)
    h = relu_layer(h, w12, b12)                      # fc12 + relu
    h = relu_layer(h, w2, b2)                        # fc2  + relu
    h = relu_layer(h, w3, b3)                        # fc3  + relu
    h = relu_layer(h, w11, b11)                      # fc11 + relu
    h = relu_layer(h, w4, b4)                        # fc4  + relu
    h = relu_layer(h, w6, b6)                        # fc6  + relu
    z = linear(h.astype(jnp.bfloat16), w7, b7)       # fc7 -> [1, TILE_B] f32
    # sigmoid via EUP exp + EUP approx reciprocal (keeps VPU divide off the path)
    o_ref[...] = pl.reciprocal(1.0 + jnp.exp(-z), approx=True)


def net_forward(x, params, *, tile_b=TILE_B):
    """x: [B, cls] (any float dtype); params: list of (W [out,in], b [out,1]).

    Returns [B, 1] float32 = sigmoid output of the MLP.
    """
    B, cls = x.shape
    n_tiles = pl.cdiv(B, tile_b)
    b_pad = n_tiles * tile_b

    # Transpose so batch sits on the 128-lane axis; feed bf16 (halves x DMA).
    xt = jnp.transpose(x.astype(jnp.float32)).astype(jnp.bfloat16)   # [cls, B]
    if b_pad != B:
        xt = jnp.pad(xt, ((0, 0), (0, b_pad - B)))                   # zero tail

    flat_args = []
    in_specs = [pl.BlockSpec((cls, tile_b), lambda i: (0, i))]       # x tile
    for w, b in params:
        flat_args.append(w.astype(jnp.bfloat16))                     # [out, in] bf16
        flat_args.append(b.astype(jnp.float32))                      # [out, 1]  f32
        # Full-shape blocks, constant index_map -> VMEM-resident across the grid.
        in_specs.append(pl.BlockSpec(w.shape, lambda i: (0, 0)))
        in_specs.append(pl.BlockSpec(b.shape, lambda i: (0, 0)))

    out = pl.pallas_call(
        mlp_kernel,
        out_shape=jax.ShapeDtypeStruct((1, b_pad), jnp.float32),
        grid=(n_tiles,),
        in_specs=in_specs,
        out_specs=pl.BlockSpec((1, tile_b), lambda i: (0, i)),        # lane-dense store
        compiler_params=pltpu.CompilerParams(
            dimension_semantics=("parallel",)),                       # 2 TCs on v7x
    )(xt, *flat_args)

    return out[0, :B].reshape(B, 1)


def init_params(key):
    """PyTorch nn.Linear-style init; W stored [out, in], b stored [out, 1]."""
    params = []
    for i in range(len(LAYER_DIMS) - 1):
        d_in, d_out = LAYER_DIMS[i], LAYER_DIMS[i + 1]
        key, kw, kb = jax.random.split(key, 3)
        bound = 1.0 / float(d_in) ** 0.5
        w = jax.random.uniform(kw, (d_out, d_in), jnp.float32, -bound, bound)
        b = jax.random.uniform(kb, (d_out, 1), jnp.float32, -bound, bound)
        params.append((w, b))
    return params


def reference_forward(x, params):
    """Pure-JAX reference with the same bf16-operand / f32-accumulate precision."""
    h = x.astype(jnp.float32).astype(jnp.bfloat16)
    n = len(params)
    for i, (w, b) in enumerate(params):
        z = jnp.dot(h.astype(jnp.bfloat16), w.astype(jnp.bfloat16).T,
                    preferred_element_type=jnp.float32) + b.reshape(1, -1)
        if i < n - 1:
            h = jnp.maximum(z, 0.0)
        else:
            h = jax.nn.sigmoid(z)
    return h


if __name__ == "__main__":
    key = jax.random.PRNGKey(0)
    key, kx = jax.random.split(key)

    # Small demo batch; deliberately not a multiple of TILE_B to exercise the
    # padded tail tile (1000 -> padded to 1024 -> 2 grid steps).
    B = 1000
    x = jax.random.normal(kx, (B, CLS), dtype=jnp.float32)
    params = init_params(key)

    out = jax.block_until_ready(net_forward(x, params))
    ref = reference_forward(x, params)

    assert out.shape == (B, 1), out.shape
    max_err = float(jnp.max(jnp.abs(out - ref)))
    # approx EUP reciprocal in the sigmoid is good to ~2^-12 rel; output is in (0,1).
    assert max_err < 2e-3, max_err

    print("KERNEL_OK")
</pallas_src>

<mosaic_0001>
module attributes {stable_mosaic.version = 11 : i64} {
  func.func @mlp_kernel(%arg0: i32, %arg1: memref<16x512xbf16, #tpu.memory_space<vmem>>, %arg2: memref<128x16xbf16, #tpu.memory_space<vmem>>, %arg3: memref<128x1xf32, #tpu.memory_space<vmem>>, %arg4: memref<128x128xbf16, #tpu.memory_space<vmem>>, %arg5: memref<128x1xf32, #tpu.memory_space<vmem>>, %arg6: memref<64x128xbf16, #tpu.memory_space<vmem>>, %arg7: memref<64x1xf32, #tpu.memory_space<vmem>>, %arg8: memref<64x64xbf16, #tpu.memory_space<vmem>>, %arg9: memref<64x1xf32, #tpu.memory_space<vmem>>, %arg10: memref<32x64xbf16, #tpu.memory_space<vmem>>, %arg11: memref<32x1xf32, #tpu.memory_space<vmem>>, %arg12: memref<32x32xbf16, #tpu.memory_space<vmem>>, %arg13: memref<32x1xf32, #tpu.memory_space<vmem>>, %arg14: memref<16x32xbf16, #tpu.memory_space<vmem>>, %arg15: memref<16x1xf32, #tpu.memory_space<vmem>>, %arg16: memref<1x16xbf16, #tpu.memory_space<vmem>>, %arg17: memref<1x1xf32, #tpu.memory_space<vmem>>, %arg18: memref<1x512xf32, #tpu.memory_space<vmem>>) attributes {dimension_semantics = [#tpu.dimension_semantics<parallel>], iteration_bounds = array<i64: 2>, scalar_prefetch = 0 : i64, scratch_operands = 0 : i64, tpu.core_type = #tpu.core_type<tc>, window_params = [{transform_indices = @transform_0, window_bounds = array<i64: 16, 512>}, {pipeline_mode = #tpu.pipeline_mode<synchronous>, transform_indices = @transform_1, window_bounds = array<i64: 128, 16>}, {pipeline_mode = #tpu.pipeline_mode<synchronous>, transform_indices = @transform_2, window_bounds = array<i64: 128, 1>}, {pipeline_mode = #tpu.pipeline_mode<synchronous>, transform_indices = @transform_3, window_bounds = array<i64: 128, 128>}, {pipeline_mode = #tpu.pipeline_mode<synchronous>, transform_indices = @transform_4, window_bounds = array<i64: 128, 1>}, {pipeline_mode = #tpu.pipeline_mode<synchronous>, transform_indices = @transform_5, window_bounds = array<i64: 64, 128>}, {pipeline_mode = #tpu.pipeline_mode<synchronous>, transform_indices = @transform_6, window_bounds = array<i64: 64, 1>}, {pipeline_mode = #tpu.pipeline_mode<synchronous>, transform_indices = @transform_7, window_bounds = array<i64: 64, 64>}, {pipeline_mode = #tpu.pipeline_mode<synchronous>, transform_indices = @transform_8, window_bounds = array<i64: 64, 1>}, {pipeline_mode = #tpu.pipeline_mode<synchronous>, transform_indices = @transform_9, window_bounds = array<i64: 32, 64>}, {pipeline_mode = #tpu.pipeline_mode<synchronous>, transform_indices = @transform_10, window_bounds = array<i64: 32, 1>}, {pipeline_mode = #tpu.pipeline_mode<synchronous>, transform_indices = @transform_11, window_bounds = array<i64: 32, 32>}, {pipeline_mode = #tpu.pipeline_mode<synchronous>, transform_indices = @transform_12, window_bounds = array<i64: 32, 1>}, {pipeline_mode = #tpu.pipeline_mode<synchronous>, transform_indices = @transform_13, window_bounds = array<i64: 16, 32>}, {pipeline_mode = #tpu.pipeline_mode<synchronous>, transform_indices = @transform_14, window_bounds = array<i64: 16, 1>}, {pipeline_mode = #tpu.pipeline_mode<synchronous>, transform_indices = @transform_15, window_bounds = array<i64: 1, 16>}, {pipeline_mode = #tpu.pipeline_mode<synchronous>, transform_indices = @transform_16, window_bounds = array<i64: 1, 1>}, {transform_indices = @transform_17, window_bounds = array<i64: 1, 512>}]} {
    %c0 = arith.constant 0 : index
    %c0_0 = arith.constant 0 : index
    %0 = vector.load %arg1[%c0, %c0_0] : memref<16x512xbf16, #tpu.memory_space<vmem>>, vector<16x512xbf16>
    %c0_1 = arith.constant 0 : index
    %c0_2 = arith.constant 0 : index
    %1 = vector.load %arg2[%c0_1, %c0_2] : memref<128x16xbf16, #tpu.memory_space<vmem>>, vector<128x16xbf16>
    %cst = arith.constant dense<0.000000e+00> : vector<128x512xf32>
    %2 = tpu.matmul %1, %0, %cst {dimension_numbers = #tpu.dot_dimension_numbers<[1], [0], [0], [1], [0, 0, 1, 1], [], []>} : vector<128x16xbf16>, vector<16x512xbf16>, vector<128x512xf32> -> vector<128x512xf32>
    %c0_3 = arith.constant 0 : index
    %c0_4 = arith.constant 0 : index
    %3 = vector.load %arg3[%c0_3, %c0_4] : memref<128x1xf32, #tpu.memory_space<vmem>>, vector<128x1xf32>
    %4 = vector.broadcast %3 : vector<128x1xf32> to vector<128x512xf32>
    %5 = arith.addf %2, %4 : vector<128x512xf32>
    %cst_5 = arith.constant 0.000000e+00 : f32
    %6 = vector.broadcast %cst_5 : f32 to vector<128x512xf32>
    %7 = arith.maximumf %5, %6 : vector<128x512xf32>
    %8 = arith.truncf %7 : vector<128x512xf32> to vector<128x512xbf16>
    %c0_6 = arith.constant 0 : index
    %c0_7 = arith.constant 0 : index
    %9 = vector.load %arg4[%c0_6, %c0_7] : memref<128x128xbf16, #tpu.memory_space<vmem>>, vector<128x128xbf16>
    %cst_8 = arith.constant dense<0.000000e+00> : vector<128x512xf32>
    %10 = tpu.matmul %9, %8, %cst_8 {dimension_numbers = #tpu.dot_dimension_numbers<[1], [0], [0], [1], [0, 0, 1, 1], [], []>} : vector<128x128xbf16>, vector<128x512xbf16>, vector<128x512xf32> -> vector<128x512xf32>
    %c0_9 = arith.constant 0 : index
    %c0_10 = arith.constant 0 : index
    %11 = vector.load %arg5[%c0_9, %c0_10] : memref<128x1xf32, #tpu.memory_space<vmem>>, vector<128x1xf32>
    %12 = vector.broadcast %11 : vector<128x1xf32> to vector<128x512xf32>
    %13 = arith.addf %10, %12 : vector<128x512xf32>
    %cst_11 = arith.constant 0.000000e+00 : f32
    %14 = vector.broadcast %cst_11 : f32 to vector<128x512xf32>
    %15 = arith.maximumf %13, %14 : vector<128x512xf32>
    %16 = arith.truncf %15 : vector<128x512xf32> to vector<128x512xbf16>
    %c0_12 = arith.constant 0 : index
    %c0_13 = arith.constant 0 : index
    %17 = vector.load %arg6[%c0_12, %c0_13] : memref<64x128xbf16, #tpu.memory_space<vmem>>, vector<64x128xbf16>
    %cst_14 = arith.constant dense<0.000000e+00> : vector<64x512xf32>
    %18 = tpu.matmul %17, %16, %cst_14 {dimension_numbers = #tpu.dot_dimension_numbers<[1], [0], [0], [1], [0, 0, 1, 1], [], []>} : vector<64x128xbf16>, vector<128x512xbf16>, vector<64x512xf32> -> vector<64x512xf32>
    %c0_15 = arith.constant 0 : index
    %c0_16 = arith.constant 0 : index
    %19 = vector.load %arg7[%c0_15, %c0_16] : memref<64x1xf32, #tpu.memory_space<vmem>>, vector<64x1xf32>
    %20 = vector.broadcast %19 : vector<64x1xf32> to vector<64x512xf32>
    %21 = arith.addf %18, %20 : vector<64x512xf32>
    %cst_17 = arith.constant 0.000000e+00 : f32
    %22 = vector.broadcast %cst_17 : f32 to vector<64x512xf32>
    %23 = arith.maximumf %21, %22 : vector<64x512xf32>
    %24 = arith.truncf %23 : vector<64x512xf32> to vector<64x512xbf16>
    %c0_18 = arith.constant 0 : index
    %c0_19 = arith.constant 0 : index
    %25 = vector.load %arg8[%c0_18, %c0_19] : memref<64x64xbf16, #tpu.memory_space<vmem>>, vector<64x64xbf16>
    %cst_20 = arith.constant dense<0.000000e+00> : vector<64x512xf32>
    %26 = tpu.matmul %25, %24, %cst_20 {dimension_numbers = #tpu.dot_dimension_numbers<[1], [0], [0], [1], [0, 0, 1, 1], [], []>} : vector<64x64xbf16>, vector<64x512xbf16>, vector<64x512xf32> -> vector<64x512xf32>
    %c0_21 = arith.constant 0 : index
    %c0_22 = arith.constant 0 : index
    %27 = vector.load %arg9[%c0_21, %c0_22] : memref<64x1xf32, #tpu.memory_space<vmem>>, vector<64x1xf32>
    %28 = vector.broadcast %27 : vector<64x1xf32> to vector<64x512xf32>
    %29 = arith.addf %26, %28 : vector<64x512xf32>
    %cst_23 = arith.constant 0.000000e+00 : f32
    %30 = vector.broadcast %cst_23 : f32 to vector<64x512xf32>
    %31 = arith.maximumf %29, %30 : vector<64x512xf32>
    %32 = arith.truncf %31 : vector<64x512xf32> to vector<64x512xbf16>
    %c0_24 = arith.constant 0 : index
    %c0_25 = arith.constant 0 : index
    %33 = vector.load %arg10[%c0_24, %c0_25] : memref<32x64xbf16, #tpu.memory_space<vmem>>, vector<32x64xbf16>
    %cst_26 = arith.constant dense<0.000000e+00> : vector<32x512xf32>
    %34 = tpu.matmul %33, %32, %cst_26 {dimension_numbers = #tpu.dot_dimension_numbers<[1], [0], [0], [1], [0, 0, 1, 1], [], []>} : vector<32x64xbf16>, vector<64x512xbf16>, vector<32x512xf32> -> vector<32x512xf32>
    %c0_27 = arith.constant 0 : index
    %c0_28 = arith.constant 0 : index
    %35 = vector.load %arg11[%c0_27, %c0_28] : memref<32x1xf32, #tpu.memory_space<vmem>>, vector<32x1xf32>
    %36 = vector.broadcast %35 : vector<32x1xf32> to vector<32x512xf32>
    %37 = arith.addf %34, %36 : vector<32x512xf32>
    %cst_29 = arith.constant 0.000000e+00 : f32
    %38 = vector.broadcast %cst_29 : f32 to vector<32x512xf32>
    %39 = arith.maximumf %37, %38 : vector<32x512xf32>
    %40 = arith.truncf %39 : vector<32x512xf32> to vector<32x512xbf16>
    %c0_30 = arith.constant 0 : index
    %c0_31 = arith.constant 0 : index
    %41 = vector.load %arg12[%c0_30, %c0_31] : memref<32x32xbf16, #tpu.memory_space<vmem>>, vector<32x32xbf16>
    %cst_32 = arith.constant dense<0.000000e+00> : vector<32x512xf32>
    %42 = tpu.matmul %41, %40, %cst_32 {dimension_numbers = #tpu.dot_dimension_numbers<[1], [0], [0], [1], [0, 0, 1, 1], [], []>} : vector<32x32xbf16>, vector<32x512xbf16>, vector<32x512xf32> -> vector<32x512xf32>
    %c0_33 = arith.constant 0 : index
    %c0_34 = arith.constant 0 : index
    %43 = vector.load %arg13[%c0_33, %c0_34] : memref<32x1xf32, #tpu.memory_space<vmem>>, vector<32x1xf32>
    %44 = vector.broadcast %43 : vector<32x1xf32> to vector<32x512xf32>
    %45 = arith.addf %42, %44 : vector<32x512xf32>
    %cst_35 = arith.constant 0.000000e+00 : f32
    %46 = vector.broadcast %cst_35 : f32 to vector<32x512xf32>
    %47 = arith.maximumf %45, %46 : vector<32x512xf32>
    %48 = arith.truncf %47 : vector<32x512xf32> to vector<32x512xbf16>
    %c0_36 = arith.constant 0 : index
    %c0_37 = arith.constant 0 : index
    %49 = vector.load %arg14[%c0_36, %c0_37] : memref<16x32xbf16, #tpu.memory_space<vmem>>, vector<16x32xbf16>
    %cst_38 = arith.constant dense<0.000000e+00> : vector<16x512xf32>
    %50 = tpu.matmul %49, %48, %cst_38 {dimension_numbers = #tpu.dot_dimension_numbers<[1], [0], [0], [1], [0, 0, 1, 1], [], []>} : vector<16x32xbf16>, vector<32x512xbf16>, vector<16x512xf32> -> vector<16x512xf32>
    %c0_39 = arith.constant 0 : index
    %c0_40 = arith.constant 0 : index
    %51 = vector.load %arg15[%c0_39, %c0_40] : memref<16x1xf32, #tpu.memory_space<vmem>>, vector<16x1xf32>
    %52 = vector.broadcast %51 : vector<16x1xf32> to vector<16x512xf32>
    %53 = arith.addf %50, %52 : vector<16x512xf32>
    %cst_41 = arith.constant 0.000000e+00 : f32
    %54 = vector.broadcast %cst_41 : f32 to vector<16x512xf32>
    %55 = arith.maximumf %53, %54 : vector<16x512xf32>
    %56 = arith.truncf %55 : vector<16x512xf32> to vector<16x512xbf16>
    %c0_42 = arith.constant 0 : index
    %c0_43 = arith.constant 0 : index
    %57 = vector.load %arg16[%c0_42, %c0_43] : memref<1x16xbf16, #tpu.memory_space<vmem>>, vector<1x16xbf16>
    %cst_44 = arith.constant dense<0.000000e+00> : vector<1x512xf32>
    %58 = tpu.matmul %57, %56, %cst_44 {dimension_numbers = #tpu.dot_dimension_numbers<[1], [0], [0], [1], [0, 0, 1, 1], [], []>} : vector<1x16xbf16>, vector<16x512xbf16>, vector<1x512xf32> -> vector<1x512xf32>
    %c0_45 = arith.constant 0 : index
    %c0_46 = arith.constant 0 : index
    %59 = vector.load %arg17[%c0_45, %c0_46] : memref<1x1xf32, #tpu.memory_space<vmem>>, vector<1x1xf32>
    %60 = vector.broadcast %59 : vector<1x1xf32> to vector<1x512xf32>
    %61 = arith.addf %58, %60 : vector<1x512xf32>
    %cst_47 = arith.constant 0.000000e+00 : f32
    %62 = vector.broadcast %cst_47 : f32 to vector<1x512xf32>
    %63 = arith.subf %62, %61 : vector<1x512xf32>
    %64 = math.exp %63 : vector<1x512xf32>
    %cst_48 = arith.constant 1.000000e+00 : f32
    %65 = vector.broadcast %cst_48 : f32 to vector<1x512xf32>
    %66 = arith.addf %65, %64 : vector<1x512xf32>
    %67 = tpu.reciprocal %66 {approx = true} : vector<1x512xf32> -> vector<1x512xf32>
    %c0_49 = arith.constant 0 : index
    %c0_50 = arith.constant 0 : index
    %68 = vector.load %arg18[%c0_49, %c0_50] : memref<1x512xf32, #tpu.memory_space<vmem>>, vector<1x512xf32>
    tpu.vector_store %arg18[%c0_49, %c0_50], %67 {strides = array<i32>} : memref<1x512xf32, #tpu.memory_space<vmem>>, vector<1x512xf32>,
    return
  }
  func.func @transform_0(%arg0: i32) -> (i32, i32) {
    %c0_i32 = arith.constant 0 : i32
    %c0_i32_0 = arith.constant 0 : i32
    return %c0_i32, %arg0 : i32, i32
  }
  func.func @transform_1(%arg0: i32) -> (i32, i32) {
    %c0_i32 = arith.constant 0 : i32
    %c0_i32_0 = arith.constant 0 : i32
    %c0_i32_1 = arith.constant 0 : i32
    return %c0_i32, %c0_i32_0 : i32, i32
  }
  func.func @transform_2(%arg0: i32) -> (i32, i32) {
    %c0_i32 = arith.constant 0 : i32
    %c0_i32_0 = arith.constant 0 : i32
    %c0_i32_1 = arith.constant 0 : i32
    return %c0_i32, %c0_i32_0 : i32, i32
  }
  func.func @transform_3(%arg0: i32) -> (i32, i32) {
    %c0_i32 = arith.constant 0 : i32
    %c0_i32_0 = arith.constant 0 : i32
    %c0_i32_1 = arith.constant 0 : i32
    return %c0_i32, %c0_i32_0 : i32, i32
  }
  func.func @transform_4(%arg0: i32) -> (i32, i32) {
    %c0_i32 = arith.constant 0 : i32
    %c0_i32_0 = arith.constant 0 : i32
    %c0_i32_1 = arith.constant 0 : i32
    return %c0_i32, %c0_i32_0 : i32, i32
  }
  func.func @transform_5(%arg0: i32) -> (i32, i32) {
    %c0_i32 = arith.constant 0 : i32
    %c0_i32_0 = arith.constant 0 : i32
    %c0_i32_1 = arith.constant 0 : i32
    return %c0_i32, %c0_i32_0 : i32, i32
  }
  func.func @transform_6(%arg0: i32) -> (i32, i32) {
    %c0_i32 = arith.constant 0 : i32
    %c0_i32_0 = arith.constant 0 : i32
    %c0_i32_1 = arith.constant 0 : i32
    return %c0_i32, %c0_i32_0 : i32, i32
  }
  func.func @transform_7(%arg0: i32) -> (i32, i32) {
    %c0_i32 = arith.constant 0 : i32
    %c0_i32_0 = arith.constant 0 : i32
    %c0_i32_1 = arith.constant 0 : i32
    return %c0_i32, %c0_i32_0 : i32, i32
  }
  func.func @transform_8(%arg0: i32) -> (i32, i32) {
    %c0_i32 = arith.constant 0 : i32
    %c0_i32_0 = arith.constant 0 : i32
    %c0_i32_1 = arith.constant 0 : i32
    return %c0_i32, %c0_i32_0 : i32, i32
  }
  func.func @transform_9(%arg0: i32) -> (i32, i32) {
    %c0_i32 = arith.constant 0 : i32
    %c0_i32_0 = arith.constant 0 : i32
    %c0_i32_1 = arith.constant 0 : i32
    return %c0_i32, %c0_i32_0 : i32, i32
  }
  func.func @transform_10(%arg0: i32) -> (i32, i32) {
    %c0_i32 = arith.constant 0 : i32
    %c0_i32_0 = arith.constant 0 : i32
    %c0_i32_1 = arith.constant 0 : i32
    return %c0_i32, %c0_i32_0 : i32, i32
  }
  func.func @transform_11(%arg0: i32) -> (i32, i32) {
    %c0_i32 = arith.constant 0 : i32
    %c0_i32_0 = arith.constant 0 : i32
    %c0_i32_1 = arith.constant 0 : i32
    return %c0_i32, %c0_i32_0 : i32, i32
  }
  func.func @transform_12(%arg0: i32) -> (i32, i32) {
    %c0_i32 = arith.constant 0 : i32
    %c0_i32_0 = arith.constant 0 : i32
    %c0_i32_1 = arith.constant 0 : i32
    return %c0_i32, %c0_i32_0 : i32, i32
  }
  func.func @transform_13(%arg0: i32) -> (i32, i32) {
    %c0_i32 = arith.constant 0 : i32
    %c0_i32_0 = arith.constant 0 : i32
    %c0_i32_1 = arith.constant 0 : i32
    return %c0_i32, %c0_i32_0 : i32, i32
  }
  func.func @transform_14(%arg0: i32) -> (i32, i32) {
    %c0_i32 = arith.constant 0 : i32
    %c0_i32_0 = arith.constant 0 : i32
    %c0_i32_1 = arith.constant 0 : i32
    return %c0_i32, %c0_i32_0 : i32, i32
  }
  func.func @transform_15(%arg0: i32) -> (i32, i32) {
    %c0_i32 = arith.constant 0 : i32
    %c0_i32_0 = arith.constant 0 : i32
    %c0_i32_1 = arith.constant 0 : i32
    return %c0_i32, %c0_i32_0 : i32, i32
  }
  func.func @transform_16(%arg0: i32) -> (i32, i32) {
    %c0_i32 = arith.constant 0 : i32
    %c0_i32_0 = arith.constant 0 : i32
    %c0_i32_1 = arith.constant 0 : i32
    return %c0_i32, %c0_i32_0 : i32, i32
  }
  func.func @transform_17(%arg0: i32) -> (i32, i32) {
    %c0_i32 = arith.constant 0 : i32
    %c0_i32_0 = arith.constant 0 : i32
    return %c0_i32, %arg0 : i32, i32
  }
}

</mosaic_0001>

<bundles_post_ra>
// kernel: tpu_custom_call.1
= control target key start
LH: loop header
LB: loop body
LE: loop exit
PB: predicated region body
PF: predicated region fallthrough
CT: control target
= control target key end

     0   :  { %s3650_s0 = inlined_call_operand.vmem [shape: bf16[16,1024], index: 0, kind: input, shape index: {}]   ;;  %s3651_s1 = inlined_call_operand.vmem [shape: bf16[128,16], index: 1, kind: input, shape index: {}]   ;;  %s3652_s2 = inlined_call_operand.vmem [shape: f32[128,1], index: 2, kind: input, shape index: {}]   ;;  %s3653_s3 = inlined_call_operand.vmem [shape: bf16[128,128], index: 3, kind: input, shape index: {}]   ;;  %s3654_s4 = inlined_call_operand.vmem [shape: f32[128,1], index: 4, kind: input, shape index: {}]   ;;  %s3655_s5 = inlined_call_operand.vmem [shape: bf16[64,128], index: 5, kind: input, shape index: {}]   ;;  %s3656_s6 = inlined_call_operand.vmem [shape: f32[64,1], index: 6, kind: input, shape index: {}]   ;;  %s3657_s7 = inlined_call_operand.vmem [shape: bf16[64,64], index: 7, kind: input, shape index: {}]   ;;  %s3658_s8 = inlined_call_operand.vmem [shape: f32[64,1], index: 8, kind: input, shape index: {}]   ;;  %s3659_s9 = inlined_call_operand.vmem [shape: bf16[32,64], index: 9, kind: input, shape index: {}]   ;;  %s3660_s10 = inlined_call_operand.vmem [shape: f32[32,1], index: 10, kind: input, shape index: {}]   ;;  %s3661_s11 = inlined_call_operand.vmem [shape: bf16[32,32], index: 11, kind: input, shape index: {}]   ;;  %s3662_s12 = inlined_call_operand.vmem [shape: f32[32,1], index: 12, kind: input, shape index: {}]   ;;  %s3663_s13 = inlined_call_operand.vmem [shape: bf16[16,32], index: 13, kind: input, shape index: {}]   ;;  %s3664_s14 = inlined_call_operand.vmem [shape: f32[16,1], index: 14, kind: input, shape index: {}]   ;;  %s3665_s15 = inlined_call_operand.vmem [shape: bf16[1,16], index: 15, kind: input, shape index: {}]   ;;  %s3666_s16 = inlined_call_operand.<no memory space> [shape: f32[1,1], index: 16, kind: input, shape index: {}]   ;;  %s3667_s17 = inlined_call_operand.hbm [shape: f32[1,1024], index: 17, kind: output, shape index: {}]  }
   0x1   :  { %3672 = sst [smem:[#allocation10_spill]] %s3650_s0  ;;  %v22_v0 = vstv %s3666_s16 }
   0x2   :  { %3673 = sst [smem:[#allocation11_spill]] %s3651_s1  ;;  %23 = vst [vmem:[#allocation2] sm:$0x1] %v22_v0 }
   0x3   :  { %3674 = sst [smem:[#allocation12_spill]] %s3652_s2 }
   0x4   :  { %3675 = sst [smem:[#allocation13_spill]] %s3653_s3 }
   0x5   :  { %24 = vsyncpa [#allocation5], 0 }
   0x6   :  { %26 = vsyncpa [#allocation5 + $0x1], 0  ;;  %s3178_s26 = smov 0   ;;  %s3180_s27 = smov 0  }
   0x7   :  { %s3182_s28 = smov 0   ;;  %s3184_s29 = smov 0  }
   0x8 LB: > { %3676 = sst [smem:[#allocation7_spill]] %s3072_s27  ;;  %s3669_s16 = sadd.s32 4294967295, %s3080_s29   ;;  %s3080_s29 = sphi %s3184_s29, %s3689_s29   ;;  %s3076_s28 = sphi %s3182_s28, %s3688_s28   ;;  %s3072_s27 = sphi %s3180_s27, %s3687_s27   ;;  %s3068_s26 = sphi %s3178_s26, %s3686_s26  }
   0x9   : > { %3677 = sst [smem:[#allocation8_spill]] %s3076_s28  ;;  %s2839_s0 = sadd.s32 4294967294, %s3080_s29  }
   0xa   : > { %s3201_s30 = sadd.s32 1, %s3080_s29   ;;  %s39_s18 = sadd.s32 1, %s3076_s28 }
   0xb   : > { %s36_s19 = ssub.s32 %s3080_s29, %s3201_s30  ;;  %p46_p0 = scmp.ne.s32.totalorder %s3076_s28, %s3072_s27 }
   0xc   : > { %p37_p1 = scmp.eq.s32.totalorder %s36_s19, 0  ;;  %p47_p2 = scmp.eq.s32.totalorder %s3080_s29, 0 }
   0xd   : > { %p412_p3 = scmp.eq.s32.totalorder %s3669_s16, 1  ;;  %p417_p4 = scmp.ne.s32.totalorder %s3072_s27, %s3068_s26 }
   0xe   : > { %s3214_s1 = scalar_select %p37_p1, %s3076_s28, %s39_s18  }
   0xf   : > { %p48_p5 = por %p47_p2, %p46_p0  ;;  %p3216_p6 = por %p412_p3, %p46_p0 }
  0x10   : > { %3678 = sst [smem:[#allocation9_spill]] %s3214_s1  ;;  %p418_p7 = scmp.eq.s32.totalorder %s2839_s0, 1 }
  0x11   : > { %p2841_p9 = scmp.ge.s32.totalorder %s3080_s29, 2 }
  0x12   : > { %p3220_p8 = por %p418_p7, %p417_p4 }
  0x13   : > { %482 = sbr.rel (%p2841_p9) target bundleno = 38 (0x26), region = 80 }
  0x1a   : > { %485 = sbr.rel (!%p48_p5) target bundleno = 38 (0x26), region = 84  ;;  %s487_s22 = sand.u32 (%p48_p5), 1, %s3076_s28  }
  0x1b   : > { %s2922_s23 = sshll.u32 (%p48_p5), %s3080_s29, 4  ;;  %s2842_s24 = sshll.u32 (%p48_p5), %s487_s22, 5 }
  0x1c   : > { %s3681_s19 = sld [smem:[#allocation10_spill]] (%p48_p5)  ;;  %s489_s0 = scalar_lea.vmem (%p48_p5), [#allocation3], %s2842_s24 }
  0x22   : > { %s492_s16 = scalar_lea.vmem %s3681_s19, %s2922_s23 }
  0x23   : > { %v505_v1 = vld [vmem:[%s492_s16] sm:$0xff]  ;;  %v507_v2 = vld [vmem:[%s492_s16 + $0x8] sm:$0xff] }
  0x24   : > { %v509_v3 = vld [vmem:[%s492_s16 + $0x20] sm:$0xff]  ;;  %506 = vst [vmem:[%s489_s0] sm:$0xff] %v505_v1  ;;  %508 = vst [vmem:[%s489_s0 + $0x8] sm:$0xff] %v507_v2  ;;  %v511_v4 = vld [vmem:[%s492_s16 + $0x28] sm:$0xff] }
  0x25   : > { %510 = vst [vmem:[%s489_s0 + $0x10] sm:$0xff] %v509_v3  ;;  %512 = vst [vmem:[%s489_s0 + $0x18] sm:$0xff] %v511_v4 }
  0x26 PF: > { %p2845_p10 = scmp.ge.s32.totalorder %s3080_s29, 1  ;;  %p517_p11 = scmp.lt.s32.totalorder %s3080_s29, 3 }
  0x28   : > { %p518_p12 = pnand %p2845_p10, %p517_p11 }
  0x29   : > { %s3682_s2 = sld [smem:[#allocation12_spill]] (!%p518_p12)  ;;  %s3241_s18 = sand.u32 (!%p518_p12), 1, %s3072_s27   ;;  %v3082_v7 = vmov (!%p518_p12), 0   ;;  %vm754_vm0 = vcmask (!%p518_p12), 130048   ;;  %v1118_v29 = vld [vmem:[%s3654_s4 + $0x8] sm:$0xff] (!%p518_p12)  ;;  %v1117_v30 = vld [vmem:[%s3654_s4] sm:$0xff] (!%p518_p12) }
  0x2a   : > { %521 = sbr.rel (%p518_p12) target bundleno = 2068 (0x814), region = 107  ;;  %2966 = vset.pattern.permute.xlu1 (!%p518_p12), %v3082_v7  ;;  %2965 = vset.pattern.permute.xlu0 (!%p518_p12), %v3082_v7  ;;  %s2846_s0 = sshll.u32 (!%p518_p12), %s3241_s18, 5  ;;  %v1120_v32 = vld [vmem:[%s3654_s4 + $0x18] sm:$0xff] (!%p518_p12)  ;;  %v1119_v33 = vld [vmem:[%s3654_s4 + $0x10] sm:$0xff] (!%p518_p12)  ;;  %v1122_v34 = vld [vmem:[%s3654_s4 + $0x28] sm:$0xff] (!%p518_p12)  ;;  %vm1933_vm1 = vcmask (!%p518_p12), 523264  }
  0x2b   : > { %s526_s23 = scalar_lea.vmem (!%p518_p12), [#allocation3], %s2846_s0  ;;  %811 = vmatprep.mubr.bf16.mxu0 (!%p518_p12), %v3082_v7  ;;  %924 = vmatprep.mubr.bf16.mxu1 (!%p518_p12), %v3082_v7  ;;  %s3683_s25 = sld [smem:[#allocation11_spill]] (!%p518_p12)  ;;  %v1121_v35 = vld [vmem:[%s3654_s4 + $0x20] sm:$0xff] (!%p518_p12)  ;;  %v1124_v37 = vld [vmem:[%s3654_s4 + $0x38] sm:$0xff] (!%p518_p12)  ;;  %v1123_v38 = vld [vmem:[%s3654_s4 + $0x30] sm:$0xff] (!%p518_p12)  ;;  %vm2352_vm2 = vcmask (!%p518_p12), 261120  }
  0x2c   : > { %v2967_v10 = vld [vmem:[%s526_s23 + $0x4] ss:$16 sps:$4 sm:$0xff] (!%p518_p12)   ;;  %v2969_v11 = vld [vmem:[%s526_s23 + $0xc] ss:$16 sps:$4 sm:$0xff] (!%p518_p12)   ;;  %v2971_v12 = vld [vmem:[%s526_s23] ss:$16 sps:$4 sm:$0xff] (!%p518_p12)  }
  0x2d   : > { %779 = vmatprep.subr.bf16.mxu0 (!%p518_p12), %v2967_v10  ;;  %v2972_v13 = vld [vmem:[%s526_s23 + $0x8] ss:$16 sps:$4 sm:$0xff] (!%p518_p12)   ;;  %892 = vmatprep.subr.bf16.mxu1 (!%p518_p12), %v2969_v11  ;;  %v1125_v40 = vld [vmem:[%s3654_s4 + $0x40] sm:$0xff] (!%p518_p12)  ;;  %v1127_v43 = vld [vmem:[%s3654_s4 + $0x50] sm:$0xff] (!%p518_p12)  ;;  %s3684_s3 = sld [smem:[#allocation13_spill]] (!%p518_p12)  ;;  %s2847_s28 = sshll.u32 (!%p518_p12), %s3241_s18, 2 }
  0x2e   : > { %780 = vmatpush1.bf16.msra.mxu0 (!%p518_p12), %v2971_v12  ;;  %893 = vmatpush1.bf16.msra.mxu1 (!%p518_p12), %v2972_v13  ;;  %v1126_v39 = vld [vmem:[%s3654_s4 + $0x48] sm:$0xff] (!%p518_p12)  ;;  %v1128_v42 = vld [vmem:[%s3654_s4 + $0x58] sm:$0xff] (!%p518_p12)  ;;  %v1129_v45 = vld [vmem:[%s3654_s4 + $0x60] sm:$0xff] (!%p518_p12)  ;;  %s3685_s22 = sadd.s32 (!%p518_p12), 4294967295, %s3080_s29   ;;  %s574_s24 = scalar_lea.vmem (!%p518_p12), [#allocation4], %s2847_s28 }
  0x2f   : > { %v600_v5 = vld [vmem:[%s3682_s2 + $0x10] sm:$0xff] (!%p518_p12)  ;;  %v598_v6 = vld [vmem:[%s3682_s2] sm:$0xff] (!%p518_p12)  ;;  %v601_v8 = vld [vmem:[%s3682_s2 + $0x18] sm:$0xff] (!%p518_p12)  ;;  %s2923_s23 = sshll.u32 (!%p518_p12), %s3685_s22, 6  ;;  %s2774_s1 = sshll.u32 (!%p518_p12), %s574_s24, 4  ;;  %s3608_s1 = int_to_ptr.vmem [resolvable:$true] %s2774_s1 }
  0x30   : > { %626 = vperm.xlu1 (!%p518_p12), %2966, %v600_v5   ;;  %616 = vperm.xlu0 (!%p518_p12), %2965, %v598_v6   ;;  %v599_v9 = vld [vmem:[%s3682_s2 + $0x8] sm:$0xff] (!%p518_p12)  ;;  %v602_v15 = vld [vmem:[%s3682_s2 + $0x20] sm:$0xff] (!%p518_p12)  ;;  %v605_v17 = vld [vmem:[%s3682_s2 + $0x38] sm:$0xff] (!%p518_p12)  ;;  %s3606_s27 = scalar_lea.hbm (!%p518_p12), %s3667_s17, %s2923_s23  ;;  %s2760_s19 = scalar_lea.sflag (!%p518_p12), [#allocation5], %s3241_s18 }
  0x31   : > { %v603_v14 = vld [vmem:[%s3682_s2 + $0x28] sm:$0xff]  ;;  %v2973_v16 = vld [vmem:[%s3683_s25] sm:$0xff]   ;;  %v604_v18 = vld [vmem:[%s3682_s2 + $0x30] sm:$0xff]  ;;  %s3018_s0 = scalar_lea.vmem %s3608_s1, 64  ;;  %s3084_s28 = smov [#allocation4]  }
  0x32   : > { %2860 = vmatmul.mubr.msk.bf16.vlgmr.msra.gmra.mrb[0].mxu0 %vm754_vm0, %v2973_v16  ;;  %2868 = vmatmul.mubr.msk.bf16.vlgmr.msra.gmra.mrb[0].mxu1 %vm754_vm0, %v2973_v16  ;;  %v607_v19 = vld [vmem:[%s3682_s2 + $0x48] sm:$0xff]  ;;  %v606_v20 = vld [vmem:[%s3682_s2 + $0x40] sm:$0xff]  ;;  %v609_v22 = vld [vmem:[%s3682_s2 + $0x58] sm:$0xff]  ;;  %p3019_p13 = scmp.ne.s32.totalorder %s3608_s1, %s3018_s0  ;;  %s3022_s22 = sshll.u32 %s3084_s28, 4  ;;  %s3023_s22 = int_to_ptr.vmem [resolvable:$false] %s3022_s22 }
  0x33   : > { %821 = vmatprep.mubr.bf16.mxu0 %v3082_v7  ;;  %934 = vmatprep.mubr.bf16.mxu1 %v3082_v7  ;;  %v2974_v21 = vld [vmem:[%s3683_s25 + $0x8] sm:$0xff]   ;;  %v608_v23 = vld [vmem:[%s3682_s2 + $0x50] sm:$0xff]  ;;  %v610_v25 = vld [vmem:[%s3682_s2 + $0x60] sm:$0xff]  ;;  %p3025_p2 = scmp.lt.s32.totalorder %s3608_s1, %s3023_s22 }
  0x34   : > { %631 = vperm.xlu1 %2966, %v601_v8   ;;  %621 = vperm.xlu0 %2965, %v599_v9   ;;  %v611_v24 = vld [vmem:[%s3682_s2 + $0x68] sm:$0xff]  ;;  %v2975_v26 = vld [vmem:[%s3683_s25 + $0x10] sm:$0xff]   ;;  %v613_v27 = vld [vmem:[%s3682_s2 + $0x78] sm:$0xff]  ;;  %p3020_p0 = pnand %p3019_p13, %p3216_p6 }
  0x35   : > { %v612_v28 = vld [vmem:[%s3682_s2 + $0x70] sm:$0xff]  ;;  %v2976_v31 = vld [vmem:[%s3683_s25 + $0x18] sm:$0xff]   ;;  %v2977_v36 = vld [vmem:[%s3683_s25 + $0x20] sm:$0xff]  }
  0x36   : > { %v2978_v41 = vld [vmem:[%s3683_s25 + $0x28] sm:$0xff]   ;;  %v2979_v46 = vld [vmem:[%s3683_s25 + $0x30] sm:$0xff]   ;;  %v1132_v47 = vld [vmem:[%s3654_s4 + $0x78] sm:$0xff]  ;;  %p3021_p1 = pneg %p3020_p0 }
  0x37   : > { %v1130_v44 = vld [vmem:[%s3654_s4 + $0x68] sm:$0xff]  ;;  %v1131_v48 = vld [vmem:[%s3654_s4 + $0x70] sm:$0xff]  ;;  %v1591_v50 = vld [vmem:[%s3656_s6] sm:$0xff] }
  0x38   : > { %641 = vperm.xlu1 %2966, %v603_v14   ;;  %636 = vperm.xlu0 %2965, %v602_v15   ;;  %v1592_v49 = vld [vmem:[%s3656_s6 + $0x8] sm:$0xff]  ;;  %v2980_v51 = vld [vmem:[%s3683_s25 + $0x38] sm:$0xff]   ;;  %v1593_v53 = vld [vmem:[%s3656_s6 + $0x10] sm:$0xff] }
  0x39   : > { %v1594_v52 = vld [vmem:[%s3656_s6 + $0x18] sm:$0xff]  ;;  %v1596_v54 = vld [vmem:[%s3656_s6 + $0x28] sm:$0xff]  ;;  %v1595_v55 = vld [vmem:[%s3656_s6 + $0x20] sm:$0xff] }
  0x3a   : > { %2861 = vmatmul.mubr.msk.bf16.gmra.mrb[4].mxu0 %vm754_vm0, %v2974_v21  ;;  %2869 = vmatmul.mubr.msk.bf16.gmra.mrb[4].mxu1 %vm754_vm0, %v2974_v21  ;;  %v1598_v56 = vld [vmem:[%s3656_s6 + $0x38] sm:$0xff]  ;;  %v1597_v57 = vld [vmem:[%s3656_s6 + $0x30] sm:$0xff]  ;;  %v1866_v58 = vld [vmem:[%s3658_s8 + $0x8] sm:$0xff] }
  0x3b   : > { %831 = vmatprep.mubr.bf16.mxu0 %v3082_v7  ;;  %944 = vmatprep.mubr.bf16.mxu1 %v3082_v7  ;;  %v1865_v59 = vld [vmem:[%s3658_s8] sm:$0xff]  ;;  %v1868_v60 = vld [vmem:[%s3658_s8 + $0x18] sm:$0xff]  ;;  %v1867_v61 = vld [vmem:[%s3658_s8 + $0x10] sm:$0xff] }
  0x3c   : > { %651 = vperm.xlu1 %2966, %v605_v17   ;;  %646 = vperm.xlu0 %2965, %v604_v18   ;;  %v1870_v62 = vld [vmem:[%s3658_s8 + $0x28] sm:$0xff]  ;;  %v1869_v63 = vld [vmem:[%s3658_s8 + $0x20] sm:$0xff]  ;;  %v1872_v0 = vld [vmem:[%s3658_s8 + $0x38] sm:$0xff] }
  0x3d   : > { %v1871_v1 = vld [vmem:[%s3658_s8 + $0x30] sm:$0xff]  ;;  %v2145_v2 = vld [vmem:[%s3660_s10 + $0x8] sm:$0xff]  ;;  %v2144_v3 = vld [vmem:[%s3660_s10] sm:$0xff] }
  0x3e   : > { %v2147_v4 = vld [vmem:[%s3660_s10 + $0x18] sm:$0xff]  ;;  %v2146_v5 = vld [vmem:[%s3660_s10 + $0x10] sm:$0xff]  ;;  %v2319_v6 = vld [vmem:[%s3662_s12 + $0x8] sm:$0xff] }
  0x3f   : > { %v2318_v8 = vld [vmem:[%s3662_s12] sm:$0xff]  ;;  %v2321_v9 = vld [vmem:[%s3662_s12 + $0x18] sm:$0xff]  ;;  %v2320_v10 = vld [vmem:[%s3662_s12 + $0x10] sm:$0xff] }
  0x40   : > { %661 = vperm.xlu1 %2966, %v607_v19   ;;  %656 = vperm.xlu0 %2965, %v606_v20   ;;  %v2492_v11 = vld [vmem:[%s3664_s14 + $0x8] sm:$0xff]  ;;  %v2491_v12 = vld [vmem:[%s3664_s14] sm:$0xff] }
  0x41   : > { %v2610_v13 = vld [vmem:[#allocation2] sm:$0x1] }
  0x42   : > { %2862 = vmatmul.mubr.msk.bf16.gmra.mrb[8].mxu0 %vm754_vm0, %v2975_v26  ;;  %2870 = vmatmul.mubr.msk.bf16.gmra.mrb[8].mxu1 %vm754_vm0, %v2975_v26 }
  0x43   : > { %841 = vmatprep.mubr.bf16.mxu0 %v3082_v7  ;;  %954 = vmatprep.mubr.bf16.mxu1 %v3082_v7 }
  0x44   : > { %671 = vperm.xlu1 %2966, %v609_v22   ;;  %666 = vperm.xlu0 %2965, %v608_v23  }
  0x48   : > { %681 = vperm.xlu1 %2966, %v611_v24   ;;  %676 = vperm.xlu0 %2965, %v610_v25  }
  0x4a   : > { %2863 = vmatmul.mubr.msk.bf16.gmra.mrb[12].mxu0 %vm754_vm0, %v2976_v31  ;;  %2871 = vmatmul.mubr.msk.bf16.gmra.mrb[12].mxu1 %vm754_vm0, %v2976_v31 }
  0x4b   : > { %851 = vmatprep.mubr.bf16.mxu0 %v3082_v7  ;;  %964 = vmatprep.mubr.bf16.mxu1 %v3082_v7 }
  0x4c   : > { %691 = vperm.xlu1 %2966, %v613_v27   ;;  %686 = vperm.xlu0 %2965, %v612_v28  }
  0x50   : > { %1140 = vperm.xlu1 %2966, %v1118_v29   ;;  %1135 = vperm.xlu0 %2965, %v1117_v30  }
  0x52   : > { %2864 = vmatmul.mubr.msk.bf16.gmra.mrb[16].mxu0 %vm754_vm0, %v2977_v36  ;;  %2872 = vmatmul.mubr.msk.bf16.gmra.mrb[16].mxu1 %vm754_vm0, %v2977_v36 }
  0x53   : > { %861 = vmatprep.mubr.bf16.mxu0 %v3082_v7  ;;  %974 = vmatprep.mubr.bf16.mxu1 %v3082_v7 }
  0x54   : > { %1150 = vperm.xlu1 %2966, %v1120_v32   ;;  %1145 = vperm.xlu0 %2965, %v1119_v33  }
  0x58   : > { %1160 = vperm.xlu1 %2966, %v1122_v34   ;;  %1155 = vperm.xlu0 %2965, %v1121_v35  }
  0x5a   : > { %2865 = vmatmul.mubr.msk.bf16.gmra.mrb[20].mxu0 %vm754_vm0, %v2978_v41  ;;  %2873 = vmatmul.mubr.msk.bf16.gmra.mrb[20].mxu1 %vm754_vm0, %v2978_v41 }
  0x5b   : > { %871 = vmatprep.mubr.bf16.mxu0 %v3082_v7  ;;  %984 = vmatprep.mubr.bf16.mxu1 %v3082_v7 }
  0x5c   : > { %1170 = vperm.xlu1 %2966, %v1124_v37   ;;  %1165 = vperm.xlu0 %2965, %v1123_v38  }
  0x60   : > { %1180 = vperm.xlu1 %2966, %v1126_v39   ;;  %1175 = vperm.xlu0 %2965, %v1125_v40  }
  0x62   : > { %2866 = vmatmul.mubr.msk.bf16.gmra.mrb[24].mxu0 %vm754_vm0, %v2979_v46  ;;  %2874 = vmatmul.mubr.msk.bf16.gmra.mrb[24].mxu1 %vm754_vm0, %v2979_v46 }
  0x63   : > { %881 = vmatprep.mubr.bf16.mxu0 %v3082_v7  ;;  %994 = vmatprep.mubr.bf16.mxu1 %v3082_v7 }
  0x64   : > { %1190 = vperm.xlu1 %2966, %v1128_v42   ;;  %1185 = vperm.xlu0 %2965, %v1127_v43  }
  0x68   : > { %1200 = vperm.xlu1 %2966, %v1130_v44   ;;  %1195 = vperm.xlu0 %2965, %v1129_v45  }
  0x6a   : > { %2867 = vmatmul.mubr.msk.bf16.gmra.mrb[28].mxu0 %vm754_vm0, %v2980_v51  ;;  %2875 = vmatmul.mubr.msk.bf16.gmra.mrb[28].mxu1 %vm754_vm0, %v2980_v51 }
  0x6b   : > { %1293 = vmatprep.mubr.bf16.mxu0 %v3082_v7  ;;  %1406 = vmatprep.mubr.bf16.mxu1 %v3082_v7 }
  0x6c   : > { %1210 = vperm.xlu1 %2966, %v1132_v47   ;;  %1205 = vperm.xlu0 %2965, %v1131_v48  }
  0x70   : > { %1606 = vperm.xlu1 %2966, %v1592_v49   ;;  %1601 = vperm.xlu0 %2965, %v1591_v50  }
  0x74   : > { %1616 = vperm.xlu1 %2966, %v1594_v52   ;;  %1611 = vperm.xlu0 %2965, %v1593_v53  }
  0x78   : > { %1626 = vperm.xlu1 %2966, %v1596_v54   ;;  %1621 = vperm.xlu0 %2965, %v1595_v55  }
  0x7c   : > { %1636 = vperm.xlu1 %2966, %v1598_v56   ;;  %1631 = vperm.xlu0 %2965, %v1597_v57  }
  0x80   : > { %1880 = vperm.xlu1 %2966, %v1866_v58   ;;  %1875 = vperm.xlu0 %2965, %v1865_v59  }
  0x84   : > { %1890 = vperm.xlu1 %2966, %v1868_v60   ;;  %1885 = vperm.xlu0 %2965, %v1867_v61  }
  0x88   : > { %1900 = vperm.xlu1 %2966, %v1870_v62   ;;  %1895 = vperm.xlu0 %2965, %v1869_v63  }
  0x8c   : > { %1910 = vperm.xlu1 %2966, %v1872_v0   ;;  %1905 = vperm.xlu0 %2965, %v1871_v1  }
  0x90   : > { %2155 = vperm.xlu1 %2966, %v2145_v2   ;;  %2150 = vperm.xlu0 %2965, %v2144_v3  }
  0x94   : > { %2165 = vperm.xlu1 %2966, %v2147_v4   ;;  %2160 = vperm.xlu0 %2965, %v2146_v5  }
  0x98   : > { %2329 = vperm.xlu1 %2966, %v2319_v6   ;;  %2324 = vperm.xlu0 %2965, %v2318_v8  }
  0x9c   : > { %2339 = vperm.xlu1 %2966, %v2321_v9   ;;  %2334 = vperm.xlu0 %2965, %v2320_v10  }
  0xa0   : > { %2500 = vperm.xlu1 %2966, %v2492_v11   ;;  %2495 = vperm.xlu0 %2965, %v2491_v12  }
  0xa4   : > { %2613 = vperm.xlu0 %2965, %v2610_v13  }
  0xaf   : > { %v617_v14 = vpop.permute.xlu0 %616  ;;  %v627_v15 = vpop.permute.xlu1 %626 }
  0xb3   : > { %v622_v16 = vpop.permute.xlu0 %621  ;;  %v632_v43 = vpop.permute.xlu1 %631 }
  0xb7   : > { %v642_v11 = vpop.permute.xlu1 %641  ;;  %v637_v12 = vpop.permute.xlu0 %636 }
 0x105   : > { %v813_v17 = vpop.f32.mrb[0].mxu0  ;;  %v926_v18 = vpop.f32.mrb[0].mxu1 }
 0x106   : > { %v814_v19 = vadd.f32 %v813_v17, %v617_v14  ;;  %v927_v20 = vadd.f32 %v926_v18, %v617_v14  ;;  %v815_v21 = vpop.f32.mrb[1].mxu0  ;;  %v928_v22 = vpop.f32.mrb[1].mxu1 }
 0x107   : > { %v816_v23 = vadd.f32 %v815_v21, %v617_v14  ;;  %v929_v24 = vadd.f32 %v928_v22, %v617_v14  ;;  %v817_v25 = vpop.f32.mrb[2].mxu0  ;;  %v930_v26 = vpop.f32.mrb[2].mxu1 }
 0x108   : > { %v818_v27 = vadd.f32 %v817_v25, %v622_v16  ;;  %v931_v28 = vadd.f32 %v930_v26, %v622_v16  ;;  %v819_v29 = vpop.f32.mrb[3].mxu0  ;;  %v932_v30 = vpop.f32.mrb[3].mxu1  ;;  %v1005_v33 = vmax.f32 %v814_v19, 0.0  ;;  %v1007_v34 = vmax.f32 %v927_v20, 0.0 }
 0x109   : > { %v820_v31 = vadd.f32 %v819_v29, %v622_v16  ;;  %v933_v32 = vadd.f32 %v932_v30, %v622_v16  ;;  %v1006_v37 = vmax.f32 %v816_v23, 0.0  ;;  %v1008_v38 = vmax.f32 %v929_v24, 0.0 }
 0x10a   : > { %v1009_v35 = vmax.f32 %v818_v27, 0.0  ;;  %v1011_v36 = vmax.f32 %v931_v28, 0.0 }
 0x10b   : > { %v1010_v39 = vmax.f32 %v820_v31, 0.0  ;;  %v1012_v40 = vmax.f32 %v933_v32, 0.0 }
 0x10c   : > { %v1069_v41 = vpack.c.bf16 %v1009_v35, %v1005_v33  ;;  %v1071_v42 = vpack.c.bf16 %v1011_v36, %v1007_v34  ;;  %v647_v33 = vpop.permute.xlu0 %646 }
 0x10d   : > { %v1070_v44 = vpack.c.bf16 %v1010_v39, %v1006_v37  ;;  %v1072_v45 = vpack.c.bf16 %v1012_v40, %v1008_v38  ;;  %v823_v46 = vpop.f32.mrb[4].mxu0  ;;  %v936_v47 = vpop.f32.mrb[4].mxu1 }
 0x10e   : > { %v824_v48 = vadd.f32 %v823_v46, %v627_v15  ;;  %v937_v49 = vadd.f32 %v936_v47, %v627_v15  ;;  %v825_v50 = vpop.f32.mrb[5].mxu0  ;;  %v938_v51 = vpop.f32.mrb[5].mxu1 }
 0x10f   : > { %1261 = vmatprep.subr.bf16.mxu0 %v1070_v44  ;;  %1374 = vmatprep.subr.bf16.mxu1 %v1072_v45  ;;  %v826_v52 = vadd.f32 %v825_v50, %v627_v15  ;;  %v939_v53 = vadd.f32 %v938_v51, %v627_v15  ;;  %v827_v54 = vpop.f32.mrb[6].mxu0  ;;  %v940_v55 = vpop.f32.mrb[6].mxu1 }
 0x110   : > { %1262 = vmatpush1.bf16.msra.mxu0 %v1069_v41  ;;  %1375 = vmatpush1.bf16.msra.mxu1 %v1071_v42  ;;  %v828_v56 = vadd.f32 %v827_v54, %v632_v43  ;;  %v941_v57 = vadd.f32 %v940_v55, %v632_v43  ;;  %v829_v58 = vpop.f32.mrb[7].mxu0  ;;  %v942_v59 = vpop.f32.mrb[7].mxu1  ;;  %v1013_v62 = vmax.f32 %v824_v48, 0.0  ;;  %v1015_v63 = vmax.f32 %v937_v49, 0.0 }
 0x111   : > { %v830_v60 = vadd.f32 %v829_v58, %v632_v43  ;;  %v943_v61 = vadd.f32 %v942_v59, %v632_v43  ;;  %v1014_v2 = vmax.f32 %v826_v52, 0.0  ;;  %v1016_v3 = vmax.f32 %v939_v53, 0.0  ;;  %v652_v42 = vpop.permute.xlu1 %651 }
 0x112   : > { %v1017_v0 = vmax.f32 %v828_v56, 0.0  ;;  %v1019_v1 = vmax.f32 %v941_v57, 0.0 }
 0x113   : > { %v1018_v4 = vmax.f32 %v830_v60, 0.0  ;;  %v1020_v5 = vmax.f32 %v943_v61, 0.0 }
 0x114   : > { %v1073_v6 = vpack.c.bf16 %v1017_v0, %v1013_v62  ;;  %v1075_v8 = vpack.c.bf16 %v1019_v1, %v1015_v63 }
 0x115   : > { %v833_v9 = vpop.f32.mrb[8].mxu0  ;;  %v946_v10 = vpop.f32.mrb[8].mxu1  ;;  %v1074_v13 = vpack.c.bf16 %v1018_v4, %v1014_v2  ;;  %v1076_v14 = vpack.c.bf16 %v1020_v5, %v1016_v3 }
 0x116   : > { %v834_v15 = vadd.f32 %v833_v9, %v637_v12  ;;  %v947_v16 = vadd.f32 %v946_v10, %v637_v12  ;;  %v835_v17 = vpop.f32.mrb[9].mxu0  ;;  %v948_v18 = vpop.f32.mrb[9].mxu1 }
 0x117   : > { %v836_v19 = vadd.f32 %v835_v17, %v637_v12  ;;  %v949_v20 = vadd.f32 %v948_v18, %v637_v12  ;;  %v837_v21 = vpop.f32.mrb[10].mxu0  ;;  %v950_v22 = vpop.f32.mrb[10].mxu1  ;;  %1263 = vmatprep.subr.bf16.mxu0 %v1074_v13  ;;  %1376 = vmatprep.subr.bf16.mxu1 %v1076_v14 }
 0x118   : > { %v838_v23 = vadd.f32 %v837_v21, %v642_v11  ;;  %v951_v24 = vadd.f32 %v950_v22, %v642_v11  ;;  %v839_v25 = vpop.f32.mrb[11].mxu0  ;;  %v952_v26 = vpop.f32.mrb[11].mxu1  ;;  %1264 = vmatpush1.bf16.msra.mxu0 %v1073_v6  ;;  %1377 = vmatpush1.bf16.msra.mxu1 %v1075_v8  ;;  %v1021_v29 = vmax.f32 %v834_v15, 0.0  ;;  %v1023_v30 = vmax.f32 %v947_v16, 0.0 }
 0x119   : > { %v840_v27 = vadd.f32 %v839_v25, %v642_v11  ;;  %v953_v28 = vadd.f32 %v952_v26, %v642_v11  ;;  %v1022_v34 = vmax.f32 %v836_v19, 0.0  ;;  %v1024_v35 = vmax.f32 %v949_v20, 0.0  ;;  %v662_v1 = vpop.permute.xlu1 %661  ;;  %v657_v2 = vpop.permute.xlu0 %656 }
 0x11a   : > { %v1025_v31 = vmax.f32 %v838_v23, 0.0  ;;  %v1027_v32 = vmax.f32 %v951_v24, 0.0 }
 0x11b   : > { %v1026_v36 = vmax.f32 %v840_v27, 0.0  ;;  %v1028_v37 = vmax.f32 %v953_v28, 0.0 }
 0x11c   : > { %v1077_v38 = vpack.c.bf16 %v1025_v31, %v1021_v29  ;;  %v1079_v39 = vpack.c.bf16 %v1027_v32, %v1023_v30 }
 0x11d   : > { %v843_v40 = vpop.f32.mrb[12].mxu0  ;;  %v956_v41 = vpop.f32.mrb[12].mxu1  ;;  %v1078_v43 = vpack.c.bf16 %v1026_v36, %v1022_v34  ;;  %v1080_v44 = vpack.c.bf16 %v1028_v37, %v1024_v35 }
 0x11e   : > { %v844_v45 = vadd.f32 %v843_v40, %v647_v33  ;;  %v845_v46 = vpop.f32.mrb[13].mxu0  ;;  %v957_v47 = vadd.f32 %v956_v41, %v647_v33  ;;  %v958_v49 = vpop.f32.mrb[13].mxu1 }
 0x11f   : > { %v846_v48 = vadd.f32 %v845_v46, %v647_v33  ;;  %v847_v50 = vpop.f32.mrb[14].mxu0  ;;  %v959_v51 = vadd.f32 %v958_v49, %v647_v33  ;;  %v960_v53 = vpop.f32.mrb[14].mxu1  ;;  %1265 = vmatprep.subr.bf16.mxu0 %v1078_v43  ;;  %1378 = vmatprep.subr.bf16.mxu1 %v1080_v44 }
 0x120   : > { %v848_v52 = vadd.f32 %v847_v50, %v652_v42  ;;  %v849_v54 = vpop.f32.mrb[15].mxu0  ;;  %v961_v55 = vadd.f32 %v960_v53, %v652_v42  ;;  %v962_v57 = vpop.f32.mrb[15].mxu1  ;;  %1266 = vmatpush1.bf16.msra.mxu0 %v1077_v38  ;;  %1379 = vmatpush1.bf16.msra.mxu1 %v1079_v39  ;;  %v1029_v58 = vmax.f32 %v844_v45, 0.0  ;;  %v1031_v61 = vmax.f32 %v957_v47, 0.0 }
 0x121   : > { %v850_v56 = vadd.f32 %v849_v54, %v652_v42  ;;  %v963_v60 = vadd.f32 %v962_v57, %v652_v42  ;;  %v1030_v62 = vmax.f32 %v846_v48, 0.0  ;;  %v1032_v3 = vmax.f32 %v959_v51, 0.0  ;;  %v672_v34 = vpop.permute.xlu1 %671  ;;  %v667_v35 = vpop.permute.xlu0 %666 }
 0x122   : > { %v1033_v59 = vmax.f32 %v848_v52, 0.0  ;;  %v1035_v63 = vmax.f32 %v961_v55, 0.0 }
 0x123   : > { %v1034_v0 = vmax.f32 %v850_v56, 0.0  ;;  %v1036_v5 = vmax.f32 %v963_v60, 0.0 }
 0x124   : > { %v1081_v4 = vpack.c.bf16 %v1033_v59, %v1029_v58  ;;  %v1083_v6 = vpack.c.bf16 %v1035_v63, %v1031_v61 }
 0x125   : > { %v1082_v8 = vpack.c.bf16 %v1034_v0, %v1030_v62  ;;  %v853_v9 = vpop.f32.mrb[16].mxu0  ;;  %v966_v10 = vpop.f32.mrb[16].mxu1  ;;  %v1084_v11 = vpack.c.bf16 %v1036_v5, %v1032_v3 }
 0x126   : > { %v854_v12 = vadd.f32 %v853_v9, %v657_v2  ;;  %v967_v13 = vadd.f32 %v966_v10, %v657_v2  ;;  %v855_v14 = vpop.f32.mrb[17].mxu0  ;;  %v968_v15 = vpop.f32.mrb[17].mxu1 }
 0x127   : > { %v856_v16 = vadd.f32 %v855_v14, %v657_v2  ;;  %v969_v17 = vadd.f32 %v968_v15, %v657_v2  ;;  %v857_v18 = vpop.f32.mrb[18].mxu0  ;;  %v970_v19 = vpop.f32.mrb[18].mxu1  ;;  %1267 = vmatprep.subr.bf16.mxu0 %v1082_v8  ;;  %1380 = vmatprep.subr.bf16.mxu1 %v1084_v11 }
 0x128   : > { %v858_v20 = vadd.f32 %v857_v18, %v662_v1  ;;  %v971_v21 = vadd.f32 %v970_v19, %v662_v1  ;;  %v859_v22 = vpop.f32.mrb[19].mxu0  ;;  %v972_v23 = vpop.f32.mrb[19].mxu1  ;;  %1268 = vmatpush1.bf16.msra.mxu0 %v1081_v4  ;;  %1381 = vmatpush1.bf16.msra.mxu1 %v1083_v6  ;;  %v1037_v26 = vmax.f32 %v854_v12, 0.0  ;;  %v1039_v27 = vmax.f32 %v967_v13, 0.0 }
 0x129   : > { %v860_v24 = vadd.f32 %v859_v22, %v662_v1  ;;  %v973_v25 = vadd.f32 %v972_v23, %v662_v1  ;;  %v1038_v30 = vmax.f32 %v856_v16, 0.0  ;;  %v1040_v31 = vmax.f32 %v969_v17, 0.0  ;;  %v682_v0 = vpop.permute.xlu1 %681  ;;  %v677_v1 = vpop.permute.xlu0 %676 }
 0x12a   : > { %v1041_v28 = vmax.f32 %v858_v20, 0.0  ;;  %v1043_v29 = vmax.f32 %v971_v21, 0.0 }
 0x12b   : > { %v1042_v32 = vmax.f32 %v860_v24, 0.0  ;;  %v1044_v33 = vmax.f32 %v973_v25, 0.0 }
 0x12c   : > { %v1085_v36 = vpack.c.bf16 %v1041_v28, %v1037_v26  ;;  %v1087_v37 = vpack.c.bf16 %v1043_v29, %v1039_v27 }
 0x12d   : > { %v1086_v38 = vpack.c.bf16 %v1042_v32, %v1038_v30  ;;  %v1088_v39 = vpack.c.bf16 %v1044_v33, %v1040_v31  ;;  %v863_v40 = vpop.f32.mrb[20].mxu0  ;;  %v976_v41 = vpop.f32.mrb[20].mxu1 }
 0x12e   : > { %v864_v42 = vadd.f32 %v863_v40, %v667_v35  ;;  %v977_v43 = vadd.f32 %v976_v41, %v667_v35  ;;  %v865_v44 = vpop.f32.mrb[21].mxu0  ;;  %v978_v45 = vpop.f32.mrb[21].mxu1 }
 0x12f   : > { %v866_v46 = vadd.f32 %v865_v44, %v667_v35  ;;  %v979_v47 = vadd.f32 %v978_v45, %v667_v35  ;;  %v867_v48 = vpop.f32.mrb[22].mxu0  ;;  %v980_v49 = vpop.f32.mrb[22].mxu1  ;;  %1269 = vmatprep.subr.bf16.mxu0 %v1086_v38  ;;  %1382 = vmatprep.subr.bf16.mxu1 %v1088_v39 }
 0x130   : > { %v868_v50 = vadd.f32 %v867_v48, %v672_v34  ;;  %v981_v51 = vadd.f32 %v980_v49, %v672_v34  ;;  %v869_v52 = vpop.f32.mrb[23].mxu0  ;;  %v982_v53 = vpop.f32.mrb[23].mxu1  ;;  %1270 = vmatpush1.bf16.msra.mxu0 %v1085_v36  ;;  %1383 = vmatpush1.bf16.msra.mxu1 %v1087_v37  ;;  %v1045_v56 = vmax.f32 %v864_v42, 0.0  ;;  %v1047_v57 = vmax.f32 %v977_v43, 0.0 }
 0x131   : > { %v870_v54 = vadd.f32 %v869_v52, %v672_v34  ;;  %v983_v55 = vadd.f32 %v982_v53, %v672_v34  ;;  %v1046_v60 = vmax.f32 %v866_v46, 0.0  ;;  %v1048_v61 = vmax.f32 %v979_v47, 0.0  ;;  %v692_v31 = vpop.permute.xlu1 %691  ;;  %v687_v32 = vpop.permute.xlu0 %686 }
 0x132   : > { %v1049_v58 = vmax.f32 %v868_v50, 0.0  ;;  %v1051_v59 = vmax.f32 %v981_v51, 0.0 }
 0x133   : > { %v1050_v62 = vmax.f32 %v870_v54, 0.0  ;;  %v1052_v63 = vmax.f32 %v983_v55, 0.0 }
 0x134   : > { %v1089_v2 = vpack.c.bf16 %v1049_v58, %v1045_v56  ;;  %v1091_v3 = vpack.c.bf16 %v1051_v59, %v1047_v57 }
 0x135   : > { %v1090_v4 = vpack.c.bf16 %v1050_v62, %v1046_v60  ;;  %v1092_v5 = vpack.c.bf16 %v1052_v63, %v1048_v61  ;;  %v873_v6 = vpop.f32.mrb[24].mxu0  ;;  %v986_v8 = vpop.f32.mrb[24].mxu1 }
 0x136   : > { %v874_v9 = vadd.f32 %v873_v6, %v677_v1  ;;  %v987_v10 = vadd.f32 %v986_v8, %v677_v1  ;;  %v875_v11 = vpop.f32.mrb[25].mxu0  ;;  %v988_v12 = vpop.f32.mrb[25].mxu1  ;;  %v2986_v6 = vld [vmem:[%s3684_s3 + $0x28] sm:$0xff]   ;;  %v2987_v8 = vld [vmem:[%s3684_s3 + $0x30] sm:$0xff]  }
 0x137   : > { %v876_v13 = vadd.f32 %v875_v11, %v677_v1  ;;  %v989_v14 = vadd.f32 %v988_v12, %v677_v1  ;;  %v877_v15 = vpop.f32.mrb[26].mxu0  ;;  %v990_v16 = vpop.f32.mrb[26].mxu1  ;;  %1271 = vmatprep.subr.bf16.mxu0 %v1090_v4  ;;  %1384 = vmatprep.subr.bf16.mxu1 %v1092_v5  ;;  %v2981_v1 = vld [vmem:[%s3684_s3] sm:$0xff]   ;;  %v2984_v4 = vld [vmem:[%s3684_s3 + $0x18] sm:$0xff]  }
 0x138   : > { %v878_v17 = vadd.f32 %v877_v15, %v682_v0  ;;  %v991_v18 = vadd.f32 %v990_v16, %v682_v0  ;;  %v879_v19 = vpop.f32.mrb[27].mxu0  ;;  %v992_v20 = vpop.f32.mrb[27].mxu1  ;;  %1272 = vmatpush1.bf16.msra.mxu0 %v1089_v2  ;;  %1385 = vmatpush1.bf16.msra.mxu1 %v1091_v3  ;;  %v1053_v23 = vmax.f32 %v874_v9, 0.0  ;;  %v1055_v24 = vmax.f32 %v987_v10, 0.0  ;;  %v2982_v2 = vld [vmem:[%s3684_s3 + $0x8] sm:$0xff]   ;;  %v2983_v3 = vld [vmem:[%s3684_s3 + $0x10] sm:$0xff]  }
 0x139   : > { %v880_v21 = vadd.f32 %v879_v19, %v682_v0  ;;  %v993_v22 = vadd.f32 %v992_v20, %v682_v0  ;;  %v1054_v27 = vmax.f32 %v876_v13, 0.0  ;;  %v1056_v28 = vmax.f32 %v989_v14, 0.0  ;;  %v2985_v5 = vld [vmem:[%s3684_s3 + $0x20] sm:$0xff]   ;;  %v2988_v9 = vld [vmem:[%s3684_s3 + $0x38] sm:$0xff]   ;;  %v1141_v10 = vpop.permute.xlu1 %1140  ;;  %v1136_v11 = vpop.permute.xlu0 %1135  ;;  %s3024_s3 = scalar_lea.vmem %s3023_s22, 128 }
 0x13a   : > { %v1057_v25 = vmax.f32 %v878_v17, 0.0  ;;  %v1059_v26 = vmax.f32 %v991_v18, 0.0  ;;  %p3026_p3 = scmp.lt.s32.totalorder %s3024_s3, %s3018_s0 }
 0x13b   : > { %v1058_v29 = vmax.f32 %v880_v21, 0.0  ;;  %v1060_v30 = vmax.f32 %v993_v22, 0.0 }
 0x13c   : > { %v1093_v33 = vpack.c.bf16 %v1057_v25, %v1053_v23  ;;  %v1095_v34 = vpack.c.bf16 %v1059_v26, %v1055_v24  ;;  %p3027_p4 = por %p3026_p3, %p3025_p2 }
 0x13d   : > { %v1094_v35 = vpack.c.bf16 %v1058_v29, %v1054_v27  ;;  %v1096_v36 = vpack.c.bf16 %v1060_v30, %v1056_v28  ;;  %v883_v37 = vpop.f32.mrb[28].mxu0  ;;  %v996_v38 = vpop.f32.mrb[28].mxu1 }
 0x13e   : > { %v884_v39 = vadd.f32 %v883_v37, %v687_v32  ;;  %v997_v40 = vadd.f32 %v996_v38, %v687_v32  ;;  %v885_v41 = vpop.f32.mrb[29].mxu0  ;;  %v998_v42 = vpop.f32.mrb[29].mxu1  ;;  %p3028_p5 = pnand %p3027_p4, %p3021_p1 }
 0x13f   : > { %v886_v43 = vadd.f32 %v885_v41, %v687_v32  ;;  %v999_v44 = vadd.f32 %v998_v42, %v687_v32  ;;  %v887_v45 = vpop.f32.mrb[30].mxu0  ;;  %v1000_v46 = vpop.f32.mrb[30].mxu1  ;;  %1273 = vmatprep.subr.bf16.mxu0 %v1094_v35  ;;  %1386 = vmatprep.subr.bf16.mxu1 %v1096_v36 }
 0x140   : > { %v888_v47 = vadd.f32 %v887_v45, %v692_v31  ;;  %v1001_v48 = vadd.f32 %v1000_v46, %v692_v31  ;;  %v889_v49 = vpop.f32.mrb[31].mxu0  ;;  %v1002_v50 = vpop.f32.mrb[31].mxu1  ;;  %1274 = vmatpush1.bf16.msra.mxu0 %v1093_v33  ;;  %1387 = vmatpush1.bf16.msra.mxu1 %v1095_v34  ;;  %v1061_v53 = vmax.f32 %v884_v39, 0.0  ;;  %v1063_v54 = vmax.f32 %v997_v40, 0.0 }
 0x141   : > { %v890_v51 = vadd.f32 %v889_v49, %v692_v31  ;;  %v1003_v52 = vadd.f32 %v1002_v50, %v692_v31  ;;  %v1062_v57 = vmax.f32 %v886_v43, 0.0  ;;  %v1064_v58 = vmax.f32 %v999_v44, 0.0  ;;  %v1151_v36 = vpop.permute.xlu1 %1150  ;;  %v1146_v37 = vpop.permute.xlu0 %1145 }
 0x142   : > { %v1065_v55 = vmax.f32 %v888_v47, 0.0  ;;  %v1067_v56 = vmax.f32 %v1001_v48, 0.0 }
 0x143   : > { %v1066_v59 = vmax.f32 %v890_v51, 0.0  ;;  %v1068_v60 = vmax.f32 %v1003_v52, 0.0 }
 0x144   : > { %v1097_v61 = vpack.c.bf16 %v1065_v55, %v1061_v53  ;;  %v1099_v62 = vpack.c.bf16 %v1067_v56, %v1063_v54 }
 0x145   : > { %v1098_v63 = vpack.c.bf16 %v1066_v59, %v1062_v57  ;;  %v1100_v0 = vpack.c.bf16 %v1068_v60, %v1064_v58 }
 0x147   : > { %1275 = vmatprep.subr.bf16.mxu0 %v1098_v63  ;;  %1388 = vmatprep.subr.bf16.mxu1 %v1100_v0 }
 0x148   : > { %1276 = vmatpush1.bf16.msra.mxu0 %v1097_v61  ;;  %1389 = vmatpush1.bf16.msra.mxu1 %v1099_v62 }
 0x14b   : > { %1294 = vmatmul.mubr.bf16.vlgmr.msra.gmra.mrb[32].mxu0 %v2981_v1  ;;  %1407 = vmatmul.mubr.bf16.vlgmr.msra.gmra.mrb[32].mxu1 %v2981_v1 }
 0x14c   : > { %1303 = vmatprep.mubr.bf16.mxu0 %v3082_v7  ;;  %1416 = vmatprep.mubr.bf16.mxu1 %v3082_v7 }
 0x153   : > { %1304 = vmatmul.mubr.bf16.gmra.mrb[36].mxu0 %v2982_v2  ;;  %1417 = vmatmul.mubr.bf16.gmra.mrb[36].mxu1 %v2982_v2  ;;  %v1161_v2 = vpop.permute.xlu1 %1160 }
 0x154   : > { %1313 = vmatprep.mubr.bf16.mxu0 %v3082_v7  ;;  %1426 = vmatprep.mubr.bf16.mxu1 %v3082_v7 }
 0x15b   : > { %1314 = vmatmul.mubr.bf16.gmra.mrb[40].mxu0 %v2983_v3  ;;  %1427 = vmatmul.mubr.bf16.gmra.mrb[40].mxu1 %v2983_v3  ;;  %v1156_v3 = vpop.permute.xlu0 %1155 }
 0x15c   : > { %1323 = vmatprep.mubr.bf16.mxu0 %v3082_v7  ;;  %1436 = vmatprep.mubr.bf16.mxu1 %v3082_v7 }
 0x163   : > { %1324 = vmatmul.mubr.bf16.gmra.mrb[44].mxu0 %v2984_v4  ;;  %1437 = vmatmul.mubr.bf16.gmra.mrb[44].mxu1 %v2984_v4 }
 0x164   : > { %1333 = vmatprep.mubr.bf16.mxu0 %v3082_v7  ;;  %1446 = vmatprep.mubr.bf16.mxu1 %v3082_v7 }
 0x16b   : > { %1334 = vmatmul.mubr.bf16.gmra.mrb[48].mxu0 %v2985_v5  ;;  %1447 = vmatmul.mubr.bf16.gmra.mrb[48].mxu1 %v2985_v5 }
 0x16c   : > { %1343 = vmatprep.mubr.bf16.mxu0 %v3082_v7  ;;  %1456 = vmatprep.mubr.bf16.mxu1 %v3082_v7 }
 0x173   : > { %1344 = vmatmul.mubr.bf16.gmra.mrb[52].mxu0 %v2986_v6  ;;  %1457 = vmatmul.mubr.bf16.gmra.mrb[52].mxu1 %v2986_v6 }
 0x174   : > { %1353 = vmatprep.mubr.bf16.mxu0 %v3082_v7  ;;  %1466 = vmatprep.mubr.bf16.mxu1 %v3082_v7 }
 0x17b   : > { %1354 = vmatmul.mubr.bf16.gmra.mrb[56].mxu0 %v2987_v8  ;;  %1467 = vmatmul.mubr.bf16.gmra.mrb[56].mxu1 %v2987_v8 }
 0x17c   : > { %1363 = vmatprep.mubr.bf16.mxu0 %v3082_v7  ;;  %1476 = vmatprep.mubr.bf16.mxu1 %v3082_v7 }
 0x183   : > { %1364 = vmatmul.mubr.bf16.gmra.mrb[60].mxu0 %v2988_v9  ;;  %1477 = vmatmul.mubr.bf16.gmra.mrb[60].mxu1 %v2988_v9 }
 0x184   : > { %1695 = vmatprep.mubr.bf16.mxu0 %v3082_v7  ;;  %1768 = vmatprep.mubr.bf16.mxu1 %v3082_v7 }
 0x21e   : > { %v1295_v12 = vpop.f32.mrb[32].mxu0  ;;  %v1408_v13 = vpop.f32.mrb[32].mxu1 }
 0x21f   : > { %v1296_v14 = vadd.f32 %v1295_v12, %v1136_v11  ;;  %v1409_v15 = vadd.f32 %v1408_v13, %v1136_v11  ;;  %v1297_v16 = vpop.f32.mrb[33].mxu0  ;;  %v1410_v17 = vpop.f32.mrb[33].mxu1 }
 0x220   : > { %v1298_v18 = vadd.f32 %v1297_v16, %v1136_v11  ;;  %v1411_v19 = vadd.f32 %v1410_v17, %v1136_v11  ;;  %v1299_v20 = vpop.f32.mrb[34].mxu0  ;;  %v1412_v21 = vpop.f32.mrb[34].mxu1 }
 0x221   : > { %v1300_v22 = vadd.f32 %v1299_v20, %v1141_v10  ;;  %v1413_v23 = vadd.f32 %v1412_v21, %v1141_v10  ;;  %v1301_v24 = vpop.f32.mrb[35].mxu0  ;;  %v1414_v25 = vpop.f32.mrb[35].mxu1  ;;  %v1487_v28 = vmax.f32 %v1296_v14, 0.0  ;;  %v1489_v29 = vmax.f32 %v1409_v15, 0.0 }
 0x222   : > { %v1302_v26 = vadd.f32 %v1301_v24, %v1141_v10  ;;  %v1415_v27 = vadd.f32 %v1414_v25, %v1141_v10  ;;  %v1488_v32 = vmax.f32 %v1298_v18, 0.0  ;;  %v1490_v33 = vmax.f32 %v1411_v19, 0.0 }
 0x223   : > { %v1491_v30 = vmax.f32 %v1300_v22, 0.0  ;;  %v1493_v31 = vmax.f32 %v1413_v23, 0.0 }
 0x224   : > { %v1492_v34 = vmax.f32 %v1302_v26, 0.0  ;;  %v1494_v35 = vmax.f32 %v1415_v27, 0.0 }
 0x225   : > { %v1551_v38 = vpack.c.bf16 %v1491_v30, %v1487_v28  ;;  %v1553_v39 = vpack.c.bf16 %v1493_v31, %v1489_v29 }
 0x226   : > { %v1552_v40 = vpack.c.bf16 %v1492_v34, %v1488_v32  ;;  %v1554_v41 = vpack.c.bf16 %v1494_v35, %v1490_v33  ;;  %v1305_v42 = vpop.f32.mrb[36].mxu0  ;;  %v1418_v43 = vpop.f32.mrb[36].mxu1 }
 0x227   : > { %v1306_v44 = vadd.f32 %v1305_v42, %v1146_v37  ;;  %v1419_v45 = vadd.f32 %v1418_v43, %v1146_v37  ;;  %v1307_v46 = vpop.f32.mrb[37].mxu0  ;;  %v1420_v47 = vpop.f32.mrb[37].mxu1 }
 0x228   : > { %v1308_v48 = vadd.f32 %v1307_v46, %v1146_v37  ;;  %v1421_v49 = vadd.f32 %v1420_v47, %v1146_v37  ;;  %v1309_v50 = vpop.f32.mrb[38].mxu0  ;;  %v1422_v51 = vpop.f32.mrb[38].mxu1  ;;  %1663 = vmatprep.subr.bf16.mxu0 %v1552_v40  ;;  %1736 = vmatprep.subr.bf16.mxu1 %v1554_v41 }
 0x229   : > { %v1310_v52 = vadd.f32 %v1309_v50, %v1151_v36  ;;  %v1423_v53 = vadd.f32 %v1422_v51, %v1151_v36  ;;  %v1311_v54 = vpop.f32.mrb[39].mxu0  ;;  %v1424_v55 = vpop.f32.mrb[39].mxu1  ;;  %1664 = vmatpush1.bf16.msra.mxu0 %v1551_v38  ;;  %1737 = vmatpush1.bf16.msra.mxu1 %v1553_v39  ;;  %v1495_v58 = vmax.f32 %v1306_v44, 0.0  ;;  %v1497_v59 = vmax.f32 %v1419_v45, 0.0 }
 0x22a   : > { %v1312_v56 = vadd.f32 %v1311_v54, %v1151_v36  ;;  %v1425_v57 = vadd.f32 %v1424_v55, %v1151_v36  ;;  %v1496_v62 = vmax.f32 %v1308_v48, 0.0  ;;  %v1498_v63 = vmax.f32 %v1421_v49, 0.0  ;;  %v1171_v33 = vpop.permute.xlu1 %1170  ;;  %v1166_v34 = vpop.permute.xlu0 %1165 }
 0x22b   : > { %v1499_v60 = vmax.f32 %v1310_v52, 0.0  ;;  %v1501_v61 = vmax.f32 %v1423_v53, 0.0 }
 0x22c   : > { %v1500_v0 = vmax.f32 %v1312_v56, 0.0  ;;  %v1502_v1 = vmax.f32 %v1425_v57, 0.0 }
 0x22d   : > { %v1555_v4 = vpack.c.bf16 %v1499_v60, %v1495_v58  ;;  %v1557_v5 = vpack.c.bf16 %v1501_v61, %v1497_v59 }
 0x22e   : > { %v1556_v6 = vpack.c.bf16 %v1500_v0, %v1496_v62  ;;  %v1558_v8 = vpack.c.bf16 %v1502_v1, %v1498_v63  ;;  %v1315_v9 = vpop.f32.mrb[40].mxu0  ;;  %v1428_v10 = vpop.f32.mrb[40].mxu1 }
 0x22f   : > { %v1316_v11 = vadd.f32 %v1315_v9, %v1156_v3  ;;  %v1429_v12 = vadd.f32 %v1428_v10, %v1156_v3  ;;  %v1317_v13 = vpop.f32.mrb[41].mxu0  ;;  %v1430_v14 = vpop.f32.mrb[41].mxu1 }
 0x230   : > { %v1318_v15 = vadd.f32 %v1317_v13, %v1156_v3  ;;  %v1431_v16 = vadd.f32 %v1430_v14, %v1156_v3  ;;  %v1319_v17 = vpop.f32.mrb[42].mxu0  ;;  %v1432_v18 = vpop.f32.mrb[42].mxu1  ;;  %1665 = vmatprep.subr.bf16.mxu0 %v1556_v6  ;;  %1738 = vmatprep.subr.bf16.mxu1 %v1558_v8 }
 0x231   : > { %v1320_v19 = vadd.f32 %v1319_v17, %v1161_v2  ;;  %v1433_v20 = vadd.f32 %v1432_v18, %v1161_v2  ;;  %v1321_v21 = vpop.f32.mrb[43].mxu0  ;;  %v1434_v22 = vpop.f32.mrb[43].mxu1  ;;  %1666 = vmatpush1.bf16.msra.mxu0 %v1555_v4  ;;  %1739 = vmatpush1.bf16.msra.mxu1 %v1557_v5  ;;  %v1503_v25 = vmax.f32 %v1316_v11, 0.0  ;;  %v1505_v26 = vmax.f32 %v1429_v12, 0.0 }
 0x232   : > { %v1322_v23 = vadd.f32 %v1321_v21, %v1161_v2  ;;  %v1435_v24 = vadd.f32 %v1434_v22, %v1161_v2  ;;  %v1504_v29 = vmax.f32 %v1318_v15, 0.0  ;;  %v1506_v30 = vmax.f32 %v1431_v16, 0.0  ;;  %v1181_v63 = vpop.permute.xlu1 %1180  ;;  %v1176_v0 = vpop.permute.xlu0 %1175 }
 0x233   : > { %v1507_v27 = vmax.f32 %v1320_v19, 0.0  ;;  %v1509_v28 = vmax.f32 %v1433_v20, 0.0 }
 0x234   : > { %v1508_v31 = vmax.f32 %v1322_v23, 0.0  ;;  %v1510_v32 = vmax.f32 %v1435_v24, 0.0 }
 0x235   : > { %v1559_v35 = vpack.c.bf16 %v1507_v27, %v1503_v25  ;;  %v1561_v36 = vpack.c.bf16 %v1509_v28, %v1505_v26 }
 0x236   : > { %v1560_v37 = vpack.c.bf16 %v1508_v31, %v1504_v29  ;;  %v1562_v38 = vpack.c.bf16 %v1510_v32, %v1506_v30  ;;  %v1325_v39 = vpop.f32.mrb[44].mxu0  ;;  %v1438_v40 = vpop.f32.mrb[44].mxu1 }
 0x237   : > { %v1326_v41 = vadd.f32 %v1325_v39, %v1166_v34  ;;  %v1439_v42 = vadd.f32 %v1438_v40, %v1166_v34  ;;  %v1327_v43 = vpop.f32.mrb[45].mxu0  ;;  %v1440_v44 = vpop.f32.mrb[45].mxu1 }
 0x238   : > { %v1328_v45 = vadd.f32 %v1327_v43, %v1166_v34  ;;  %v1441_v46 = vadd.f32 %v1440_v44, %v1166_v34  ;;  %v1329_v47 = vpop.f32.mrb[46].mxu0  ;;  %v1442_v48 = vpop.f32.mrb[46].mxu1  ;;  %1667 = vmatprep.subr.bf16.mxu0 %v1560_v37  ;;  %1740 = vmatprep.subr.bf16.mxu1 %v1562_v38 }
 0x239   : > { %v1330_v49 = vadd.f32 %v1329_v47, %v1171_v33  ;;  %v1443_v50 = vadd.f32 %v1442_v48, %v1171_v33  ;;  %v1331_v51 = vpop.f32.mrb[47].mxu0  ;;  %v1444_v52 = vpop.f32.mrb[47].mxu1  ;;  %1668 = vmatpush1.bf16.msra.mxu0 %v1559_v35  ;;  %1741 = vmatpush1.bf16.msra.mxu1 %v1561_v36  ;;  %v1511_v55 = vmax.f32 %v1326_v41, 0.0  ;;  %v1513_v56 = vmax.f32 %v1439_v42, 0.0 }
 0x23a   : > { %v1332_v53 = vadd.f32 %v1331_v51, %v1171_v33  ;;  %v1445_v54 = vadd.f32 %v1444_v52, %v1171_v33  ;;  %v1512_v59 = vmax.f32 %v1328_v45, 0.0  ;;  %v1514_v60 = vmax.f32 %v1441_v46, 0.0  ;;  %v1191_v30 = vpop.permute.xlu1 %1190  ;;  %v1186_v31 = vpop.permute.xlu0 %1185 }
 0x23b   : > { %v1515_v57 = vmax.f32 %v1330_v49, 0.0  ;;  %v1517_v58 = vmax.f32 %v1443_v50, 0.0 }
 0x23c   : > { %v1516_v61 = vmax.f32 %v1332_v53, 0.0  ;;  %v1518_v62 = vmax.f32 %v1445_v54, 0.0 }
 0x23d   : > { %v1563_v1 = vpack.c.bf16 %v1515_v57, %v1511_v55  ;;  %v1565_v2 = vpack.c.bf16 %v1517_v58, %v1513_v56 }
 0x23e   : > { %v1564_v3 = vpack.c.bf16 %v1516_v61, %v1512_v59  ;;  %v1566_v4 = vpack.c.bf16 %v1518_v62, %v1514_v60  ;;  %v1335_v5 = vpop.f32.mrb[48].mxu0  ;;  %v1448_v6 = vpop.f32.mrb[48].mxu1 }
 0x23f   : > { %v1336_v8 = vadd.f32 %v1335_v5, %v1176_v0  ;;  %v1449_v9 = vadd.f32 %v1448_v6, %v1176_v0  ;;  %v1337_v10 = vpop.f32.mrb[49].mxu0  ;;  %v1450_v11 = vpop.f32.mrb[49].mxu1 }
 0x240   : > { %v1338_v12 = vadd.f32 %v1337_v10, %v1176_v0  ;;  %v1451_v13 = vadd.f32 %v1450_v11, %v1176_v0  ;;  %v1339_v14 = vpop.f32.mrb[50].mxu0  ;;  %v1452_v15 = vpop.f32.mrb[50].mxu1  ;;  %1669 = vmatprep.subr.bf16.mxu0 %v1564_v3  ;;  %1742 = vmatprep.subr.bf16.mxu1 %v1566_v4 }
 0x241   : > { %v1340_v16 = vadd.f32 %v1339_v14, %v1181_v63  ;;  %v1453_v17 = vadd.f32 %v1452_v15, %v1181_v63  ;;  %v1341_v18 = vpop.f32.mrb[51].mxu0  ;;  %v1454_v19 = vpop.f32.mrb[51].mxu1  ;;  %1670 = vmatpush1.bf16.msra.mxu0 %v1563_v1  ;;  %1743 = vmatpush1.bf16.msra.mxu1 %v1565_v2  ;;  %v1519_v22 = vmax.f32 %v1336_v8, 0.0  ;;  %v1521_v23 = vmax.f32 %v1449_v9, 0.0 }
 0x242   : > { %v1342_v20 = vadd.f32 %v1341_v18, %v1181_v63  ;;  %v1455_v21 = vadd.f32 %v1454_v19, %v1181_v63  ;;  %v1520_v26 = vmax.f32 %v1338_v12, 0.0  ;;  %v1522_v27 = vmax.f32 %v1451_v13, 0.0  ;;  %v1201_v60 = vpop.permute.xlu1 %1200  ;;  %v1196_v61 = vpop.permute.xlu0 %1195 }
 0x243   : > { %v1523_v24 = vmax.f32 %v1340_v16, 0.0  ;;  %v1525_v25 = vmax.f32 %v1453_v17, 0.0 }
 0x244   : > { %v1524_v28 = vmax.f32 %v1342_v20, 0.0  ;;  %v1526_v29 = vmax.f32 %v1455_v21, 0.0 }
 0x245   : > { %v1567_v32 = vpack.c.bf16 %v1523_v24, %v1519_v22  ;;  %v1569_v33 = vpack.c.bf16 %v1525_v25, %v1521_v23 }
 0x246   : > { %v1568_v34 = vpack.c.bf16 %v1524_v28, %v1520_v26  ;;  %v1570_v35 = vpack.c.bf16 %v1526_v29, %v1522_v27  ;;  %v1345_v36 = vpop.f32.mrb[52].mxu0  ;;  %v1458_v37 = vpop.f32.mrb[52].mxu1 }
 0x247   : > { %v1346_v38 = vadd.f32 %v1345_v36, %v1186_v31  ;;  %v1459_v39 = vadd.f32 %v1458_v37, %v1186_v31  ;;  %v1347_v40 = vpop.f32.mrb[53].mxu0  ;;  %v1460_v41 = vpop.f32.mrb[53].mxu1 }
 0x248   : > { %v1348_v42 = vadd.f32 %v1347_v40, %v1186_v31  ;;  %v1461_v43 = vadd.f32 %v1460_v41, %v1186_v31  ;;  %v1349_v44 = vpop.f32.mrb[54].mxu0  ;;  %v1462_v45 = vpop.f32.mrb[54].mxu1  ;;  %1671 = vmatprep.subr.bf16.mxu0 %v1568_v34  ;;  %1744 = vmatprep.subr.bf16.mxu1 %v1570_v35 }
 0x249   : > { %v1350_v46 = vadd.f32 %v1349_v44, %v1191_v30  ;;  %v1463_v47 = vadd.f32 %v1462_v45, %v1191_v30  ;;  %v1351_v48 = vpop.f32.mrb[55].mxu0  ;;  %v1464_v49 = vpop.f32.mrb[55].mxu1  ;;  %1672 = vmatpush1.bf16.msra.mxu0 %v1567_v32  ;;  %1745 = vmatpush1.bf16.msra.mxu1 %v1569_v33  ;;  %v1527_v52 = vmax.f32 %v1346_v38, 0.0  ;;  %v1529_v53 = vmax.f32 %v1459_v39, 0.0 }
 0x24a   : > { %v1352_v50 = vadd.f32 %v1351_v48, %v1191_v30  ;;  %v1465_v51 = vadd.f32 %v1464_v49, %v1191_v30  ;;  %v1528_v56 = vmax.f32 %v1348_v42, 0.0  ;;  %v1530_v57 = vmax.f32 %v1461_v43, 0.0  ;;  %v1211_v27 = vpop.permute.xlu1 %1210  ;;  %v1206_v28 = vpop.permute.xlu0 %1205 }
 0x24b   : > { %v1531_v54 = vmax.f32 %v1350_v46, 0.0  ;;  %v1533_v55 = vmax.f32 %v1463_v47, 0.0 }
 0x24c   : > { %v1532_v58 = vmax.f32 %v1352_v50, 0.0  ;;  %v1534_v59 = vmax.f32 %v1465_v51, 0.0 }
 0x24d   : > { %v1571_v62 = vpack.c.bf16 %v1531_v54, %v1527_v52  ;;  %v1573_v63 = vpack.c.bf16 %v1533_v55, %v1529_v53 }
 0x24e   : > { %v1572_v0 = vpack.c.bf16 %v1532_v58, %v1528_v56  ;;  %v1574_v1 = vpack.c.bf16 %v1534_v59, %v1530_v57  ;;  %v1355_v2 = vpop.f32.mrb[56].mxu0  ;;  %v1468_v3 = vpop.f32.mrb[56].mxu1 }
 0x24f   : > { %v1356_v4 = vadd.f32 %v1355_v2, %v1196_v61  ;;  %v1469_v5 = vadd.f32 %v1468_v3, %v1196_v61  ;;  %v1357_v6 = vpop.f32.mrb[57].mxu0  ;;  %v1470_v8 = vpop.f32.mrb[57].mxu1 }
 0x250   : > { %v1358_v9 = vadd.f32 %v1357_v6, %v1196_v61  ;;  %v1471_v10 = vadd.f32 %v1470_v8, %v1196_v61  ;;  %v1359_v11 = vpop.f32.mrb[58].mxu0  ;;  %v1472_v12 = vpop.f32.mrb[58].mxu1  ;;  %1673 = vmatprep.subr.bf16.mxu0 %v1572_v0  ;;  %1746 = vmatprep.subr.bf16.mxu1 %v1574_v1  ;;  %v2989_v61 = vld [vmem:[%s3655_s5] sm:$0xff]   ;;  %v2992_v0 = vld [vmem:[%s3655_s5 + $0x18] sm:$0xff]  }
 0x251   : > { %v1360_v13 = vadd.f32 %v1359_v11, %v1201_v60  ;;  %v1473_v14 = vadd.f32 %v1472_v12, %v1201_v60  ;;  %v1361_v15 = vpop.f32.mrb[59].mxu0  ;;  %v1474_v16 = vpop.f32.mrb[59].mxu1  ;;  %1674 = vmatpush1.bf16.msra.mxu0 %v1571_v62  ;;  %1747 = vmatpush1.bf16.msra.mxu1 %v1573_v63  ;;  %v1535_v19 = vmax.f32 %v1356_v4, 0.0  ;;  %v1537_v20 = vmax.f32 %v1469_v5, 0.0  ;;  %v2990_v62 = vld [vmem:[%s3655_s5 + $0x8] sm:$0xff]   ;;  %v2991_v63 = vld [vmem:[%s3655_s5 + $0x10] sm:$0xff]  }
 0x252   : > { %v1362_v17 = vadd.f32 %v1361_v15, %v1201_v60  ;;  %v1475_v18 = vadd.f32 %v1474_v16, %v1201_v60  ;;  %v1536_v23 = vmax.f32 %v1358_v9, 0.0  ;;  %v1538_v24 = vmax.f32 %v1471_v10, 0.0  ;;  %v1607_v1 = vpop.permute.xlu1 %1606  ;;  %v1602_v2 = vpop.permute.xlu0 %1601 }
 0x253   : > { %v1539_v21 = vmax.f32 %v1360_v13, 0.0  ;;  %v1541_v22 = vmax.f32 %v1473_v14, 0.0 }
 0x254   : > { %v1540_v25 = vmax.f32 %v1362_v17, 0.0  ;;  %v1542_v26 = vmax.f32 %v1475_v18, 0.0 }
 0x255   : > { %v1575_v29 = vpack.c.bf16 %v1539_v21, %v1535_v19  ;;  %v1577_v30 = vpack.c.bf16 %v1541_v22, %v1537_v20 }
 0x256   : > { %v1576_v31 = vpack.c.bf16 %v1540_v25, %v1536_v23  ;;  %v1578_v32 = vpack.c.bf16 %v1542_v26, %v1538_v24  ;;  %v1365_v33 = vpop.f32.mrb[60].mxu0  ;;  %v1478_v34 = vpop.f32.mrb[60].mxu1 }
 0x257   : > { %v1366_v35 = vadd.f32 %v1365_v33, %v1206_v28  ;;  %v1479_v36 = vadd.f32 %v1478_v34, %v1206_v28  ;;  %v1367_v37 = vpop.f32.mrb[61].mxu0  ;;  %v1480_v38 = vpop.f32.mrb[61].mxu1 }
 0x258   : > { %v1368_v39 = vadd.f32 %v1367_v37, %v1206_v28  ;;  %v1481_v40 = vadd.f32 %v1480_v38, %v1206_v28  ;;  %v1369_v41 = vpop.f32.mrb[62].mxu0  ;;  %v1482_v42 = vpop.f32.mrb[62].mxu1  ;;  %1675 = vmatprep.subr.bf16.mxu0 %v1576_v31  ;;  %1748 = vmatprep.subr.bf16.mxu1 %v1578_v32 }
 0x259   : > { %v1370_v43 = vadd.f32 %v1369_v41, %v1211_v27  ;;  %v1483_v44 = vadd.f32 %v1482_v42, %v1211_v27  ;;  %v1371_v45 = vpop.f32.mrb[63].mxu0  ;;  %v1484_v46 = vpop.f32.mrb[63].mxu1  ;;  %1676 = vmatpush1.bf16.msra.mxu0 %v1575_v29  ;;  %1749 = vmatpush1.bf16.msra.mxu1 %v1577_v30  ;;  %v1543_v49 = vmax.f32 %v1366_v35, 0.0  ;;  %v1545_v50 = vmax.f32 %v1479_v36, 0.0 }
 0x25a   : > { %v1372_v47 = vadd.f32 %v1371_v45, %v1211_v27  ;;  %v1485_v48 = vadd.f32 %v1484_v46, %v1211_v27  ;;  %v1544_v53 = vmax.f32 %v1368_v39, 0.0  ;;  %v1546_v54 = vmax.f32 %v1481_v40, 0.0  ;;  %v1617_v28 = vpop.permute.xlu1 %1616  ;;  %v1612_v29 = vpop.permute.xlu0 %1611 }
 0x25b   : > { %v1547_v51 = vmax.f32 %v1370_v43, 0.0  ;;  %v1549_v52 = vmax.f32 %v1483_v44, 0.0 }
 0x25c   : > { %v1548_v55 = vmax.f32 %v1372_v47, 0.0  ;;  %v1550_v56 = vmax.f32 %v1485_v48, 0.0 }
 0x25d   : > { %v1579_v57 = vpack.c.bf16 %v1547_v51, %v1543_v49  ;;  %v1581_v58 = vpack.c.bf16 %v1549_v52, %v1545_v50 }
 0x25e   : > { %v1580_v59 = vpack.c.bf16 %v1548_v55, %v1544_v53  ;;  %v1582_v60 = vpack.c.bf16 %v1550_v56, %v1546_v54 }
 0x260   : > { %1677 = vmatprep.subr.bf16.mxu0 %v1580_v59  ;;  %1750 = vmatprep.subr.bf16.mxu1 %v1582_v60  ;;  %v1622_v59 = vpop.permute.xlu0 %1621 }
 0x261   : > { %1678 = vmatpush1.bf16.msra.mxu0 %v1579_v57  ;;  %1751 = vmatpush1.bf16.msra.mxu1 %v1581_v58  ;;  %v1627_v58 = vpop.permute.xlu1 %1626 }
 0x264   : > { %1696 = vmatmul.mubr.bf16.vlgmr.msra.gmra.mrb[64].mxu0 %v2989_v61  ;;  %1769 = vmatmul.mubr.bf16.vlgmr.msra.gmra.mrb[64].mxu1 %v2989_v61 }
 0x265   : > { %1705 = vmatprep.mubr.bf16.mxu0 %v3082_v7  ;;  %1778 = vmatprep.mubr.bf16.mxu1 %v3082_v7 }
 0x26c   : > { %1706 = vmatmul.mubr.bf16.gmra.mrb[68].mxu0 %v2990_v62  ;;  %1779 = vmatmul.mubr.bf16.gmra.mrb[68].mxu1 %v2990_v62 }
 0x26d   : > { %1715 = vmatprep.mubr.bf16.mxu0 %v3082_v7  ;;  %1788 = vmatprep.mubr.bf16.mxu1 %v3082_v7 }
 0x274   : > { %1716 = vmatmul.mubr.bf16.gmra.mrb[72].mxu0 %v2991_v63  ;;  %1789 = vmatmul.mubr.bf16.gmra.mrb[72].mxu1 %v2991_v63 }
 0x275   : > { %1725 = vmatprep.mubr.bf16.mxu0 %v3082_v7  ;;  %1798 = vmatprep.mubr.bf16.mxu1 %v3082_v7 }
 0x27c   : > { %1726 = vmatmul.mubr.bf16.gmra.mrb[76].mxu0 %v2992_v0  ;;  %1799 = vmatmul.mubr.bf16.gmra.mrb[76].mxu1 %v2992_v0 }
 0x27d   : > { %1978 = vmatprep.mubr.bf16.mxu0 %v3082_v7  ;;  %2051 = vmatprep.mubr.bf16.mxu1 %v3082_v7 }
 0x337   : > { %v1697_v3 = vpop.f32.mrb[64].mxu0  ;;  %v1770_v4 = vpop.f32.mrb[64].mxu1 }
 0x338   : > { %v1698_v5 = vadd.f32 %v1697_v3, %v1602_v2  ;;  %v1771_v6 = vadd.f32 %v1770_v4, %v1602_v2  ;;  %v1699_v8 = vpop.f32.mrb[65].mxu0  ;;  %v1772_v9 = vpop.f32.mrb[65].mxu1 }
 0x339   : > { %v1700_v10 = vadd.f32 %v1699_v8, %v1602_v2  ;;  %v1773_v11 = vadd.f32 %v1772_v9, %v1602_v2  ;;  %v1701_v12 = vpop.f32.mrb[66].mxu0  ;;  %v1774_v13 = vpop.f32.mrb[66].mxu1 }
 0x33a   : > { %v1702_v14 = vadd.f32 %v1701_v12, %v1607_v1  ;;  %v1775_v15 = vadd.f32 %v1774_v13, %v1607_v1  ;;  %v1703_v16 = vpop.f32.mrb[67].mxu0  ;;  %v1776_v17 = vpop.f32.mrb[67].mxu1  ;;  %v1809_v20 = vmax.f32 %v1698_v5, 0.0  ;;  %v1811_v21 = vmax.f32 %v1771_v6, 0.0 }
 0x33b   : > { %v1704_v18 = vadd.f32 %v1703_v16, %v1607_v1  ;;  %v1777_v19 = vadd.f32 %v1776_v17, %v1607_v1  ;;  %v1810_v24 = vmax.f32 %v1700_v10, 0.0  ;;  %v1812_v25 = vmax.f32 %v1773_v11, 0.0 }
 0x33c   : > { %v1813_v22 = vmax.f32 %v1702_v14, 0.0  ;;  %v1815_v23 = vmax.f32 %v1775_v15, 0.0 }
 0x33d   : > { %v1814_v26 = vmax.f32 %v1704_v18, 0.0  ;;  %v1816_v27 = vmax.f32 %v1777_v19, 0.0 }
 0x33e   : > { %v1841_v30 = vpack.c.bf16 %v1813_v22, %v1809_v20  ;;  %v1843_v31 = vpack.c.bf16 %v1815_v23, %v1811_v21 }
 0x33f   : > { %v1842_v32 = vpack.c.bf16 %v1814_v26, %v1810_v24  ;;  %v1844_v33 = vpack.c.bf16 %v1816_v27, %v1812_v25  ;;  %v1707_v34 = vpop.f32.mrb[68].mxu0  ;;  %v1780_v35 = vpop.f32.mrb[68].mxu1 }
 0x340   : > { %v1708_v36 = vadd.f32 %v1707_v34, %v1612_v29  ;;  %v1781_v37 = vadd.f32 %v1780_v35, %v1612_v29  ;;  %v1709_v38 = vpop.f32.mrb[69].mxu0  ;;  %v1782_v39 = vpop.f32.mrb[69].mxu1 }
 0x341   : > { %v1710_v40 = vadd.f32 %v1709_v38, %v1612_v29  ;;  %v1783_v41 = vadd.f32 %v1782_v39, %v1612_v29  ;;  %v1711_v42 = vpop.f32.mrb[70].mxu0  ;;  %v1784_v43 = vpop.f32.mrb[70].mxu1  ;;  %1946 = vmatprep.subr.bf16.mxu0 %v1842_v32  ;;  %2019 = vmatprep.subr.bf16.mxu1 %v1844_v33 }
 0x342   : > { %v1712_v44 = vadd.f32 %v1711_v42, %v1617_v28  ;;  %v1785_v45 = vadd.f32 %v1784_v43, %v1617_v28  ;;  %v1713_v46 = vpop.f32.mrb[71].mxu0  ;;  %v1786_v47 = vpop.f32.mrb[71].mxu1  ;;  %1947 = vmatpush1.bf16.msra.mxu0 %v1841_v30  ;;  %2020 = vmatpush1.bf16.msra.mxu1 %v1843_v31  ;;  %v1817_v50 = vmax.f32 %v1708_v36, 0.0  ;;  %v1819_v51 = vmax.f32 %v1781_v37, 0.0 }
 0x343   : > { %v1714_v48 = vadd.f32 %v1713_v46, %v1617_v28  ;;  %v1787_v49 = vadd.f32 %v1786_v47, %v1617_v28  ;;  %v1818_v54 = vmax.f32 %v1710_v40, 0.0  ;;  %v1820_v55 = vmax.f32 %v1783_v41, 0.0  ;;  %v1637_v25 = vpop.permute.xlu1 %1636  ;;  %v1632_v26 = vpop.permute.xlu0 %1631 }
 0x344   : > { %v1821_v52 = vmax.f32 %v1712_v44, 0.0  ;;  %v1823_v53 = vmax.f32 %v1785_v45, 0.0 }
 0x345   : > { %v1822_v56 = vmax.f32 %v1714_v48, 0.0  ;;  %v1824_v57 = vmax.f32 %v1787_v49, 0.0 }
 0x346   : > { %v1845_v60 = vpack.c.bf16 %v1821_v52, %v1817_v50  ;;  %v1847_v61 = vpack.c.bf16 %v1823_v53, %v1819_v51 }
 0x347   : > { %v1846_v62 = vpack.c.bf16 %v1822_v56, %v1818_v54  ;;  %v1848_v63 = vpack.c.bf16 %v1824_v57, %v1820_v55  ;;  %v1717_v0 = vpop.f32.mrb[72].mxu0  ;;  %v1790_v1 = vpop.f32.mrb[72].mxu1 }
 0x348   : > { %v1718_v2 = vadd.f32 %v1717_v0, %v1622_v59  ;;  %v1791_v3 = vadd.f32 %v1790_v1, %v1622_v59  ;;  %v1719_v4 = vpop.f32.mrb[73].mxu0  ;;  %v1792_v5 = vpop.f32.mrb[73].mxu1 }
 0x349   : > { %v1720_v6 = vadd.f32 %v1719_v4, %v1622_v59  ;;  %v1793_v8 = vadd.f32 %v1792_v5, %v1622_v59  ;;  %v1721_v9 = vpop.f32.mrb[74].mxu0  ;;  %v1794_v10 = vpop.f32.mrb[74].mxu1  ;;  %1948 = vmatprep.subr.bf16.mxu0 %v1846_v62  ;;  %2021 = vmatprep.subr.bf16.mxu1 %v1848_v63  ;;  %v2993_v59 = vld [vmem:[%s3657_s7] sm:$0xff]   ;;  %v2996_v62 = vld [vmem:[%s3657_s7 + $0x18] sm:$0xff]  }
 0x34a   : > { %v1722_v11 = vadd.f32 %v1721_v9, %v1627_v58  ;;  %v1795_v12 = vadd.f32 %v1794_v10, %v1627_v58  ;;  %v1723_v13 = vpop.f32.mrb[75].mxu0  ;;  %v1796_v14 = vpop.f32.mrb[75].mxu1  ;;  %1949 = vmatpush1.bf16.msra.mxu0 %v1845_v60  ;;  %2022 = vmatpush1.bf16.msra.mxu1 %v1847_v61  ;;  %v1825_v17 = vmax.f32 %v1718_v2, 0.0  ;;  %v1827_v18 = vmax.f32 %v1791_v3, 0.0  ;;  %v2994_v60 = vld [vmem:[%s3657_s7 + $0x8] sm:$0xff]   ;;  %v2995_v61 = vld [vmem:[%s3657_s7 + $0x10] sm:$0xff]  }
 0x34b   : > { %v1724_v15 = vadd.f32 %v1723_v13, %v1627_v58  ;;  %v1797_v16 = vadd.f32 %v1796_v14, %v1627_v58  ;;  %v1826_v21 = vmax.f32 %v1720_v6, 0.0  ;;  %v1828_v22 = vmax.f32 %v1793_v8, 0.0  ;;  %v1881_v63 = vpop.permute.xlu1 %1880  ;;  %v1876_v0 = vpop.permute.xlu0 %1875 }
 0x34c   : > { %v1829_v19 = vmax.f32 %v1722_v11, 0.0  ;;  %v1831_v20 = vmax.f32 %v1795_v12, 0.0 }
 0x34d   : > { %v1830_v23 = vmax.f32 %v1724_v15, 0.0  ;;  %v1832_v24 = vmax.f32 %v1797_v16, 0.0 }
 0x34e   : > { %v1849_v27 = vpack.c.bf16 %v1829_v19, %v1825_v17  ;;  %v1851_v28 = vpack.c.bf16 %v1831_v20, %v1827_v18 }
 0x34f   : > { %v1850_v29 = vpack.c.bf16 %v1830_v23, %v1826_v21  ;;  %v1852_v30 = vpack.c.bf16 %v1832_v24, %v1828_v22  ;;  %v1727_v31 = vpop.f32.mrb[76].mxu0  ;;  %v1800_v32 = vpop.f32.mrb[76].mxu1 }
 0x350   : > { %v1728_v33 = vadd.f32 %v1727_v31, %v1632_v26  ;;  %v1801_v34 = vadd.f32 %v1800_v32, %v1632_v26  ;;  %v1729_v35 = vpop.f32.mrb[77].mxu0  ;;  %v1802_v36 = vpop.f32.mrb[77].mxu1 }
 0x351   : > { %v1730_v37 = vadd.f32 %v1729_v35, %v1632_v26  ;;  %v1803_v38 = vadd.f32 %v1802_v36, %v1632_v26  ;;  %v1731_v39 = vpop.f32.mrb[78].mxu0  ;;  %v1804_v40 = vpop.f32.mrb[78].mxu1  ;;  %1950 = vmatprep.subr.bf16.mxu0 %v1850_v29  ;;  %2023 = vmatprep.subr.bf16.mxu1 %v1852_v30 }
 0x352   : > { %v1732_v41 = vadd.f32 %v1731_v39, %v1637_v25  ;;  %v1805_v42 = vadd.f32 %v1804_v40, %v1637_v25  ;;  %v1733_v43 = vpop.f32.mrb[79].mxu0  ;;  %v1806_v44 = vpop.f32.mrb[79].mxu1  ;;  %1951 = vmatpush1.bf16.msra.mxu0 %v1849_v27  ;;  %2024 = vmatpush1.bf16.msra.mxu1 %v1851_v28  ;;  %v1833_v47 = vmax.f32 %v1728_v33, 0.0  ;;  %v1835_v48 = vmax.f32 %v1801_v34, 0.0 }
 0x353   : > { %v1734_v45 = vadd.f32 %v1733_v43, %v1637_v25  ;;  %v1807_v46 = vadd.f32 %v1806_v44, %v1637_v25  ;;  %v1834_v51 = vmax.f32 %v1730_v37, 0.0  ;;  %v1836_v52 = vmax.f32 %v1803_v38, 0.0  ;;  %v1891_v26 = vpop.permute.xlu1 %1890  ;;  %v1886_v27 = vpop.permute.xlu0 %1885 }
 0x354   : > { %v1837_v49 = vmax.f32 %v1732_v41, 0.0  ;;  %v1839_v50 = vmax.f32 %v1805_v42, 0.0 }
 0x355   : > { %v1838_v53 = vmax.f32 %v1734_v45, 0.0  ;;  %v1840_v54 = vmax.f32 %v1807_v46, 0.0 }
 0x356   : > { %v1853_v55 = vpack.c.bf16 %v1837_v49, %v1833_v47  ;;  %v1855_v56 = vpack.c.bf16 %v1839_v50, %v1835_v48 }
 0x357   : > { %v1854_v57 = vpack.c.bf16 %v1838_v53, %v1834_v51  ;;  %v1856_v58 = vpack.c.bf16 %v1840_v54, %v1836_v52 }
 0x359   : > { %1952 = vmatprep.subr.bf16.mxu0 %v1854_v57  ;;  %2025 = vmatprep.subr.bf16.mxu1 %v1856_v58  ;;  %v1896_v57 = vpop.permute.xlu0 %1895 }
 0x35a   : > { %1953 = vmatpush1.bf16.msra.mxu0 %v1853_v55  ;;  %2026 = vmatpush1.bf16.msra.mxu1 %v1855_v56  ;;  %v1901_v56 = vpop.permute.xlu1 %1900 }
 0x35d   : > { %2892 = vmatmul.mubr.msk.bf16.vlgmr.msra.gmra.mrb[80].mxu0 %vm1933_vm1, %v2993_v59  ;;  %2896 = vmatmul.mubr.msk.bf16.vlgmr.msra.gmra.mrb[80].mxu1 %vm1933_vm1, %v2993_v59 }
 0x35e   : > { %1988 = vmatprep.mubr.bf16.mxu0 %v3082_v7  ;;  %2061 = vmatprep.mubr.bf16.mxu1 %v3082_v7 }
 0x365   : > { %2893 = vmatmul.mubr.msk.bf16.gmra.mrb[84].mxu0 %vm1933_vm1, %v2994_v60  ;;  %2897 = vmatmul.mubr.msk.bf16.gmra.mrb[84].mxu1 %vm1933_vm1, %v2994_v60 }
 0x366   : > { %1998 = vmatprep.mubr.bf16.mxu0 %v3082_v7  ;;  %2071 = vmatprep.mubr.bf16.mxu1 %v3082_v7 }
 0x36d   : > { %2894 = vmatmul.mubr.msk.bf16.gmra.mrb[88].mxu0 %vm1933_vm1, %v2995_v61  ;;  %2898 = vmatmul.mubr.msk.bf16.gmra.mrb[88].mxu1 %vm1933_vm1, %v2995_v61 }
 0x36e   : > { %2008 = vmatprep.mubr.bf16.mxu0 %v3082_v7  ;;  %2081 = vmatprep.mubr.bf16.mxu1 %v3082_v7 }
 0x375   : > { %2895 = vmatmul.mubr.msk.bf16.gmra.mrb[92].mxu0 %vm1933_vm1, %v2996_v62  ;;  %2899 = vmatmul.mubr.msk.bf16.gmra.mrb[92].mxu1 %vm1933_vm1, %v2996_v62 }
 0x376   : > { %2216 = vmatprep.mubr.bf16.mxu0 %v3082_v7  ;;  %2269 = vmatprep.mubr.bf16.mxu1 %v3082_v7 }
 0x430   : > { %v1980_v1 = vpop.f32.mrb[80].mxu0  ;;  %v2053_v2 = vpop.f32.mrb[80].mxu1 }
 0x431   : > { %v1981_v3 = vadd.f32 %v1980_v1, %v1876_v0  ;;  %v2054_v4 = vadd.f32 %v2053_v2, %v1876_v0  ;;  %v1982_v5 = vpop.f32.mrb[81].mxu0  ;;  %v2055_v6 = vpop.f32.mrb[81].mxu1 }
 0x432   : > { %v1983_v8 = vadd.f32 %v1982_v5, %v1876_v0  ;;  %v2056_v9 = vadd.f32 %v2055_v6, %v1876_v0  ;;  %v1984_v10 = vpop.f32.mrb[82].mxu0  ;;  %v2057_v11 = vpop.f32.mrb[82].mxu1 }
 0x433   : > { %v1985_v12 = vadd.f32 %v1984_v10, %v1881_v63  ;;  %v2058_v13 = vadd.f32 %v2057_v11, %v1881_v63  ;;  %v1986_v14 = vpop.f32.mrb[83].mxu0  ;;  %v2059_v15 = vpop.f32.mrb[83].mxu1  ;;  %v2092_v18 = vmax.f32 %v1981_v3, 0.0  ;;  %v2094_v19 = vmax.f32 %v2054_v4, 0.0 }
 0x434   : > { %v1987_v16 = vadd.f32 %v1986_v14, %v1881_v63  ;;  %v2060_v17 = vadd.f32 %v2059_v15, %v1881_v63  ;;  %v2093_v22 = vmax.f32 %v1983_v8, 0.0  ;;  %v2095_v23 = vmax.f32 %v2056_v9, 0.0 }
 0x435   : > { %v2096_v20 = vmax.f32 %v1985_v12, 0.0  ;;  %v2098_v21 = vmax.f32 %v2058_v13, 0.0 }
 0x436   : > { %v2097_v24 = vmax.f32 %v1987_v16, 0.0  ;;  %v2099_v25 = vmax.f32 %v2060_v17, 0.0 }
 0x437   : > { %v2124_v28 = vpack.c.bf16 %v2096_v20, %v2092_v18  ;;  %v2126_v29 = vpack.c.bf16 %v2098_v21, %v2094_v19 }
 0x438   : > { %v2125_v30 = vpack.c.bf16 %v2097_v24, %v2093_v22  ;;  %v2127_v31 = vpack.c.bf16 %v2099_v25, %v2095_v23  ;;  %v1990_v32 = vpop.f32.mrb[84].mxu0  ;;  %v2063_v33 = vpop.f32.mrb[84].mxu1 }
 0x439   : > { %v1991_v34 = vadd.f32 %v1990_v32, %v1886_v27  ;;  %v2064_v35 = vadd.f32 %v2063_v33, %v1886_v27  ;;  %v1992_v36 = vpop.f32.mrb[85].mxu0  ;;  %v2065_v37 = vpop.f32.mrb[85].mxu1 }
 0x43a   : > { %v1993_v38 = vadd.f32 %v1992_v36, %v1886_v27  ;;  %v2066_v39 = vadd.f32 %v2065_v37, %v1886_v27  ;;  %v1994_v40 = vpop.f32.mrb[86].mxu0  ;;  %v2067_v41 = vpop.f32.mrb[86].mxu1  ;;  %2184 = vmatprep.subr.bf16.mxu0 %v2125_v30  ;;  %2237 = vmatprep.subr.bf16.mxu1 %v2127_v31 }
 0x43b   : > { %v1995_v42 = vadd.f32 %v1994_v40, %v1891_v26  ;;  %v2068_v43 = vadd.f32 %v2067_v41, %v1891_v26  ;;  %v1996_v44 = vpop.f32.mrb[87].mxu0  ;;  %v2069_v45 = vpop.f32.mrb[87].mxu1  ;;  %2185 = vmatpush1.bf16.msra.mxu0 %v2124_v28  ;;  %2238 = vmatpush1.bf16.msra.mxu1 %v2126_v29  ;;  %v2100_v48 = vmax.f32 %v1991_v34, 0.0  ;;  %v2102_v49 = vmax.f32 %v2064_v35, 0.0 }
 0x43c   : > { %v1997_v46 = vadd.f32 %v1996_v44, %v1891_v26  ;;  %v2070_v47 = vadd.f32 %v2069_v45, %v1891_v26  ;;  %v2101_v52 = vmax.f32 %v1993_v38, 0.0  ;;  %v2103_v53 = vmax.f32 %v2066_v39, 0.0  ;;  %v1911_v23 = vpop.permute.xlu1 %1910  ;;  %v1906_v24 = vpop.permute.xlu0 %1905 }
 0x43d   : > { %v2104_v50 = vmax.f32 %v1995_v42, 0.0  ;;  %v2106_v51 = vmax.f32 %v2068_v43, 0.0 }
 0x43e   : > { %v2105_v54 = vmax.f32 %v1997_v46, 0.0  ;;  %v2107_v55 = vmax.f32 %v2070_v47, 0.0 }
 0x43f   : > { %v2128_v58 = vpack.c.bf16 %v2104_v50, %v2100_v48  ;;  %v2130_v59 = vpack.c.bf16 %v2106_v51, %v2102_v49 }
 0x440   : > { %v2129_v60 = vpack.c.bf16 %v2105_v54, %v2101_v52  ;;  %v2131_v61 = vpack.c.bf16 %v2107_v55, %v2103_v53  ;;  %v2000_v62 = vpop.f32.mrb[88].mxu0  ;;  %v2073_v63 = vpop.f32.mrb[88].mxu1 }
 0x441   : > { %v2001_v0 = vadd.f32 %v2000_v62, %v1896_v57  ;;  %v2074_v1 = vadd.f32 %v2073_v63, %v1896_v57  ;;  %v2002_v2 = vpop.f32.mrb[89].mxu0  ;;  %v2075_v3 = vpop.f32.mrb[89].mxu1 }
 0x442   : > { %v2003_v4 = vadd.f32 %v2002_v2, %v1896_v57  ;;  %v2076_v5 = vadd.f32 %v2075_v3, %v1896_v57  ;;  %v2004_v6 = vpop.f32.mrb[90].mxu0  ;;  %v2077_v8 = vpop.f32.mrb[90].mxu1  ;;  %2186 = vmatprep.subr.bf16.mxu0 %v2129_v60  ;;  %2239 = vmatprep.subr.bf16.mxu1 %v2131_v61  ;;  %v2997_v57 = vld [vmem:[%s3659_s9] sm:$0xff]  }
 0x443   : > { %v2005_v9 = vadd.f32 %v2004_v6, %v1901_v56  ;;  %v2078_v10 = vadd.f32 %v2077_v8, %v1901_v56  ;;  %v2006_v11 = vpop.f32.mrb[91].mxu0  ;;  %v2079_v12 = vpop.f32.mrb[91].mxu1  ;;  %2187 = vmatpush1.bf16.msra.mxu0 %v2128_v58  ;;  %2240 = vmatpush1.bf16.msra.mxu1 %v2130_v59  ;;  %v2108_v15 = vmax.f32 %v2001_v0, 0.0  ;;  %v2110_v16 = vmax.f32 %v2074_v1, 0.0  ;;  %v2998_v58 = vld [vmem:[%s3659_s9 + $0x8] sm:$0xff]  }
 0x444   : > { %v2007_v13 = vadd.f32 %v2006_v11, %v1901_v56  ;;  %v2080_v14 = vadd.f32 %v2079_v12, %v1901_v56  ;;  %v2109_v19 = vmax.f32 %v2003_v4, 0.0  ;;  %v2111_v20 = vmax.f32 %v2076_v5, 0.0  ;;  %v2156_v59 = vpop.permute.xlu1 %2155  ;;  %v2151_v60 = vpop.permute.xlu0 %2150 }
 0x445   : > { %v2112_v17 = vmax.f32 %v2005_v9, 0.0  ;;  %v2114_v18 = vmax.f32 %v2078_v10, 0.0 }
 0x446   : > { %v2113_v21 = vmax.f32 %v2007_v13, 0.0  ;;  %v2115_v22 = vmax.f32 %v2080_v14, 0.0 }
 0x447   : > { %v2132_v25 = vpack.c.bf16 %v2112_v17, %v2108_v15  ;;  %v2134_v26 = vpack.c.bf16 %v2114_v18, %v2110_v16 }
 0x448   : > { %v2133_v27 = vpack.c.bf16 %v2113_v21, %v2109_v19  ;;  %v2135_v28 = vpack.c.bf16 %v2115_v22, %v2111_v20  ;;  %v2010_v29 = vpop.f32.mrb[92].mxu0  ;;  %v2083_v30 = vpop.f32.mrb[92].mxu1 }
 0x449   : > { %v2011_v31 = vadd.f32 %v2010_v29, %v1906_v24  ;;  %v2084_v32 = vadd.f32 %v2083_v30, %v1906_v24  ;;  %v2012_v33 = vpop.f32.mrb[93].mxu0  ;;  %v2085_v34 = vpop.f32.mrb[93].mxu1 }
 0x44a   : > { %v2013_v35 = vadd.f32 %v2012_v33, %v1906_v24  ;;  %v2086_v36 = vadd.f32 %v2085_v34, %v1906_v24  ;;  %v2014_v37 = vpop.f32.mrb[94].mxu0  ;;  %v2087_v38 = vpop.f32.mrb[94].mxu1  ;;  %2188 = vmatprep.subr.bf16.mxu0 %v2133_v27  ;;  %2241 = vmatprep.subr.bf16.mxu1 %v2135_v28 }
 0x44b   : > { %v2015_v39 = vadd.f32 %v2014_v37, %v1911_v23  ;;  %v2088_v40 = vadd.f32 %v2087_v38, %v1911_v23  ;;  %v2016_v41 = vpop.f32.mrb[95].mxu0  ;;  %v2089_v42 = vpop.f32.mrb[95].mxu1  ;;  %2189 = vmatpush1.bf16.msra.mxu0 %v2132_v25  ;;  %2242 = vmatpush1.bf16.msra.mxu1 %v2134_v26  ;;  %v2116_v45 = vmax.f32 %v2011_v31, 0.0  ;;  %v2118_v46 = vmax.f32 %v2084_v32, 0.0 }
 0x44c   : > { %v2017_v43 = vadd.f32 %v2016_v41, %v1911_v23  ;;  %v2090_v44 = vadd.f32 %v2089_v42, %v1911_v23  ;;  %v2117_v49 = vmax.f32 %v2013_v35, 0.0  ;;  %v2119_v50 = vmax.f32 %v2086_v36, 0.0  ;;  %v2166_v22 = vpop.permute.xlu1 %2165  ;;  %v2161_v23 = vpop.permute.xlu0 %2160 }
 0x44d   : > { %v2120_v47 = vmax.f32 %v2015_v39, 0.0  ;;  %v2122_v48 = vmax.f32 %v2088_v40, 0.0 }
 0x44e   : > { %v2121_v51 = vmax.f32 %v2017_v43, 0.0  ;;  %v2123_v52 = vmax.f32 %v2090_v44, 0.0 }
 0x44f   : > { %v2136_v53 = vpack.c.bf16 %v2120_v47, %v2116_v45  ;;  %v2138_v54 = vpack.c.bf16 %v2122_v48, %v2118_v46 }
 0x450   : > { %v2137_v55 = vpack.c.bf16 %v2121_v51, %v2117_v49  ;;  %v2139_v56 = vpack.c.bf16 %v2123_v52, %v2119_v50 }
 0x452   : > { %2190 = vmatprep.subr.bf16.mxu0 %v2137_v55  ;;  %2243 = vmatprep.subr.bf16.mxu1 %v2139_v56  ;;  %v2999_v56 = vld [vmem:[%s3661_s11] sm:$0xff]  }
 0x453   : > { %2191 = vmatpush1.bf16.msra.mxu0 %v2136_v53  ;;  %2244 = vmatpush1.bf16.msra.mxu1 %v2138_v54 }
 0x456   : > { %2902 = vmatmul.mubr.msk.bf16.vlgmr.msra.gmra.mrb[96].mxu0 %vm1933_vm1, %v2997_v57  ;;  %2904 = vmatmul.mubr.msk.bf16.vlgmr.msra.gmra.mrb[96].mxu1 %vm1933_vm1, %v2997_v57  ;;  %v3000_v57 = vld [vmem:[%s3661_s11 + $0x8] sm:$0xff]  }
 0x457   : > { %2226 = vmatprep.mubr.bf16.mxu0 %v3082_v7  ;;  %2279 = vmatprep.mubr.bf16.mxu1 %v3082_v7 }
 0x45e   : > { %2903 = vmatmul.mubr.msk.bf16.gmra.mrb[100].mxu0 %vm1933_vm1, %v2998_v58  ;;  %2905 = vmatmul.mubr.msk.bf16.gmra.mrb[100].mxu1 %vm1933_vm1, %v2998_v58  ;;  %v2330_v58 = vpop.permute.xlu1 %2329 }
 0x45f   : > { %2391 = vmatprep.mubr.bf16.mxu0 %v3082_v7  ;;  %2444 = vmatprep.mubr.bf16.mxu1 %v3082_v7 }
 0x529   : > { %v2218_v61 = vpop.f32.mrb[96].mxu0  ;;  %v2271_v62 = vpop.f32.mrb[96].mxu1 }
 0x52a   : > { %v2219_v63 = vadd.f32 %v2218_v61, %v2151_v60  ;;  %v2272_v0 = vadd.f32 %v2271_v62, %v2151_v60  ;;  %v2220_v1 = vpop.f32.mrb[97].mxu0  ;;  %v2273_v2 = vpop.f32.mrb[97].mxu1 }
 0x52b   : > { %v2221_v3 = vadd.f32 %v2220_v1, %v2151_v60  ;;  %v2274_v4 = vadd.f32 %v2273_v2, %v2151_v60  ;;  %v2222_v5 = vpop.f32.mrb[98].mxu0  ;;  %v2275_v6 = vpop.f32.mrb[98].mxu1 }
 0x52c   : > { %v2223_v8 = vadd.f32 %v2222_v5, %v2156_v59  ;;  %v2276_v9 = vadd.f32 %v2275_v6, %v2156_v59  ;;  %v2224_v10 = vpop.f32.mrb[99].mxu0  ;;  %v2277_v11 = vpop.f32.mrb[99].mxu1  ;;  %v2290_v14 = vmax.f32 %v2219_v63, 0.0  ;;  %v2292_v15 = vmax.f32 %v2272_v0, 0.0 }
 0x52d   : > { %v2225_v12 = vadd.f32 %v2224_v10, %v2156_v59  ;;  %v2278_v13 = vadd.f32 %v2277_v11, %v2156_v59  ;;  %v2291_v18 = vmax.f32 %v2221_v3, 0.0  ;;  %v2293_v19 = vmax.f32 %v2274_v4, 0.0  ;;  %v2325_v59 = vpop.permute.xlu0 %2324 }
 0x52e   : > { %v2294_v16 = vmax.f32 %v2223_v8, 0.0  ;;  %v2296_v17 = vmax.f32 %v2276_v9, 0.0 }
 0x52f   : > { %v2295_v20 = vmax.f32 %v2225_v12, 0.0  ;;  %v2297_v21 = vmax.f32 %v2278_v13, 0.0 }
 0x530   : > { %v2306_v24 = vpack.c.bf16 %v2294_v16, %v2290_v14  ;;  %v2308_v25 = vpack.c.bf16 %v2296_v17, %v2292_v15 }
 0x531   : > { %v2307_v26 = vpack.c.bf16 %v2295_v20, %v2291_v18  ;;  %v2309_v27 = vpack.c.bf16 %v2297_v21, %v2293_v19  ;;  %v2228_v28 = vpop.f32.mrb[100].mxu0  ;;  %v2281_v29 = vpop.f32.mrb[100].mxu1 }
 0x532   : > { %v2229_v30 = vadd.f32 %v2228_v28, %v2161_v23  ;;  %v2282_v31 = vadd.f32 %v2281_v29, %v2161_v23  ;;  %v2230_v32 = vpop.f32.mrb[101].mxu0  ;;  %v2283_v33 = vpop.f32.mrb[101].mxu1 }
 0x533   : > { %v2231_v34 = vadd.f32 %v2230_v32, %v2161_v23  ;;  %v2284_v35 = vadd.f32 %v2283_v33, %v2161_v23  ;;  %v2232_v36 = vpop.f32.mrb[102].mxu0  ;;  %v2285_v37 = vpop.f32.mrb[102].mxu1  ;;  %2359 = vmatprep.subr.bf16.mxu0 %v2307_v26  ;;  %2412 = vmatprep.subr.bf16.mxu1 %v2309_v27 }
 0x534   : > { %v2233_v38 = vadd.f32 %v2232_v36, %v2166_v22  ;;  %v2286_v39 = vadd.f32 %v2285_v37, %v2166_v22  ;;  %v2234_v40 = vpop.f32.mrb[103].mxu0  ;;  %v2287_v41 = vpop.f32.mrb[103].mxu1  ;;  %2360 = vmatpush1.bf16.msra.mxu0 %v2306_v24  ;;  %2413 = vmatpush1.bf16.msra.mxu1 %v2308_v25  ;;  %v2298_v44 = vmax.f32 %v2229_v30, 0.0  ;;  %v2300_v45 = vmax.f32 %v2282_v31, 0.0 }
 0x535   : > { %v2235_v42 = vadd.f32 %v2234_v40, %v2166_v22  ;;  %v2288_v43 = vadd.f32 %v2287_v41, %v2166_v22  ;;  %v2299_v48 = vmax.f32 %v2231_v34, 0.0  ;;  %v2301_v49 = vmax.f32 %v2284_v35, 0.0  ;;  %v2340_v21 = vpop.permute.xlu1 %2339  ;;  %v2335_v22 = vpop.permute.xlu0 %2334 }
 0x536   : > { %v2302_v46 = vmax.f32 %v2233_v38, 0.0  ;;  %v2304_v47 = vmax.f32 %v2286_v39, 0.0 }
 0x537   : > { %v2303_v50 = vmax.f32 %v2235_v42, 0.0  ;;  %v2305_v51 = vmax.f32 %v2288_v43, 0.0 }
 0x538   : > { %v2310_v52 = vpack.c.bf16 %v2302_v46, %v2298_v44  ;;  %v2312_v53 = vpack.c.bf16 %v2304_v47, %v2300_v45 }
 0x539   : > { %v2311_v54 = vpack.c.bf16 %v2303_v50, %v2299_v48  ;;  %v2313_v55 = vpack.c.bf16 %v2305_v51, %v2301_v49 }
 0x53b   : > { %2361 = vmatprep.subr.bf16.mxu0 %v2311_v54  ;;  %2414 = vmatprep.subr.bf16.mxu1 %v2313_v55  ;;  %v3001_v55 = vld [vmem:[%s3663_s13] sm:$0xff]  }
 0x53c   : > { %2362 = vmatpush1.bf16.msra.mxu0 %v2310_v52  ;;  %2415 = vmatpush1.bf16.msra.mxu1 %v2312_v53 }
 0x53f   : > { %2908 = vmatmul.mubr.msk.bf16.vlgmr.msra.gmra.mrb[104].mxu0 %vm2352_vm2, %v2999_v56  ;;  %2910 = vmatmul.mubr.msk.bf16.vlgmr.msra.gmra.mrb[104].mxu1 %vm2352_vm2, %v2999_v56  ;;  %v2501_v56 = vpop.permute.xlu1 %2500 }
 0x540   : > { %2401 = vmatprep.mubr.bf16.mxu0 %v3082_v7  ;;  %2454 = vmatprep.mubr.bf16.mxu1 %v3082_v7 }
 0x547   : > { %2909 = vmatmul.mubr.msk.bf16.gmra.mrb[108].mxu0 %vm2352_vm2, %v3000_v57  ;;  %2911 = vmatmul.mubr.msk.bf16.gmra.mrb[108].mxu1 %vm2352_vm2, %v3000_v57  ;;  %v2496_v57 = vpop.permute.xlu0 %2495 }
 0x548   : > { %2543 = vmatprep.mubr.bf16.mxu0 %v3082_v7  ;;  %2586 = vmatprep.mubr.bf16.mxu1 %v3082_v7 }
 0x612   : > { %v2393_v60 = vpop.f32.mrb[104].mxu0  ;;  %v2446_v61 = vpop.f32.mrb[104].mxu1 }
 0x613   : > { %v2394_v62 = vadd.f32 %v2393_v60, %v2325_v59  ;;  %v2447_v63 = vadd.f32 %v2446_v61, %v2325_v59  ;;  %v2395_v0 = vpop.f32.mrb[105].mxu0  ;;  %v2448_v1 = vpop.f32.mrb[105].mxu1 }
 0x614   : > { %v2396_v2 = vadd.f32 %v2395_v0, %v2325_v59  ;;  %v2449_v3 = vadd.f32 %v2448_v1, %v2325_v59  ;;  %v2397_v4 = vpop.f32.mrb[106].mxu0  ;;  %v2450_v5 = vpop.f32.mrb[106].mxu1 }
 0x615   : > { %v2398_v6 = vadd.f32 %v2397_v4, %v2330_v58  ;;  %v2451_v8 = vadd.f32 %v2450_v5, %v2330_v58  ;;  %v2399_v9 = vpop.f32.mrb[107].mxu0  ;;  %v2452_v10 = vpop.f32.mrb[107].mxu1  ;;  %v2465_v13 = vmax.f32 %v2394_v62, 0.0  ;;  %v2467_v14 = vmax.f32 %v2447_v63, 0.0 }
 0x616   : > { %v2400_v11 = vadd.f32 %v2399_v9, %v2330_v58  ;;  %v2453_v12 = vadd.f32 %v2452_v10, %v2330_v58  ;;  %v2466_v17 = vmax.f32 %v2396_v2, 0.0  ;;  %v2468_v18 = vmax.f32 %v2449_v3, 0.0 }
 0x617   : > { %v2469_v15 = vmax.f32 %v2398_v6, 0.0  ;;  %v2471_v16 = vmax.f32 %v2451_v8, 0.0 }
 0x618   : > { %v2470_v19 = vmax.f32 %v2400_v11, 0.0  ;;  %v2472_v20 = vmax.f32 %v2453_v12, 0.0 }
 0x619   : > { %v2481_v23 = vpack.c.bf16 %v2469_v15, %v2465_v13  ;;  %v2483_v24 = vpack.c.bf16 %v2471_v16, %v2467_v14 }
 0x61a   : > { %v2482_v25 = vpack.c.bf16 %v2470_v19, %v2466_v17  ;;  %v2484_v26 = vpack.c.bf16 %v2472_v20, %v2468_v18  ;;  %v2403_v27 = vpop.f32.mrb[108].mxu0  ;;  %v2456_v28 = vpop.f32.mrb[108].mxu1 }
 0x61b   : > { %v2404_v29 = vadd.f32 %v2403_v27, %v2335_v22  ;;  %v2457_v30 = vadd.f32 %v2456_v28, %v2335_v22  ;;  %v2405_v31 = vpop.f32.mrb[109].mxu0  ;;  %v2458_v32 = vpop.f32.mrb[109].mxu1 }
 0x61c   : > { %v2406_v33 = vadd.f32 %v2405_v31, %v2335_v22  ;;  %v2459_v34 = vadd.f32 %v2458_v32, %v2335_v22  ;;  %v2407_v35 = vpop.f32.mrb[110].mxu0  ;;  %v2460_v36 = vpop.f32.mrb[110].mxu1  ;;  %2511 = vmatprep.subr.bf16.mxu0 %v2482_v25  ;;  %2554 = vmatprep.subr.bf16.mxu1 %v2484_v26  ;;  %v2609_v22 = vld [vmem:[%s3665_s15] sm:$0x1] }
 0x61d   : > { %v2408_v37 = vadd.f32 %v2407_v35, %v2340_v21  ;;  %v2461_v38 = vadd.f32 %v2460_v36, %v2340_v21  ;;  %v2409_v39 = vpop.f32.mrb[111].mxu0  ;;  %v2462_v40 = vpop.f32.mrb[111].mxu1  ;;  %2512 = vmatpush1.bf16.msra.mxu0 %v2481_v23  ;;  %2555 = vmatpush1.bf16.msra.mxu1 %v2483_v24  ;;  %v2473_v43 = vmax.f32 %v2404_v29, 0.0  ;;  %v2475_v44 = vmax.f32 %v2457_v30, 0.0 }
 0x61e   : > { %v2410_v41 = vadd.f32 %v2409_v39, %v2340_v21  ;;  %v2463_v42 = vadd.f32 %v2462_v40, %v2340_v21  ;;  %v2474_v47 = vmax.f32 %v2406_v33, 0.0  ;;  %v2476_v48 = vmax.f32 %v2459_v34, 0.0  ;;  %v2614_v26 = vpop.permute.xlu0 %2613 }
 0x61f   : > { %v2477_v45 = vmax.f32 %v2408_v37, 0.0  ;;  %v2479_v46 = vmax.f32 %v2461_v38, 0.0  ;;  %v2616_v23 = vlaneseq }
 0x620   : > { %v2478_v49 = vmax.f32 %v2410_v41, 0.0  ;;  %v2480_v50 = vmax.f32 %v2463_v42, 0.0 }
 0x621   : > { %v2485_v51 = vpack.c.bf16 %v2477_v45, %v2473_v43  ;;  %v2487_v52 = vpack.c.bf16 %v2479_v46, %v2475_v44  ;;  %v2617_v24 = vshrl.u32 %v2616_v23, 7  ;;  %vm2756_vm3 = vcmp.lt.s32.totalorder %v2616_v23, 512 }
 0x622   : > { %v2486_v53 = vpack.c.bf16 %v2478_v49, %v2474_v47  ;;  %v2488_v54 = vpack.c.bf16 %v2480_v50, %v2476_v48 }
 0x623   : > { %v2618_v25 = vsub.s32 0, %v2617_v24 }
 0x624   : > { %2513 = vmatprep.subr.bf16.mxu0 %v2486_v53  ;;  %2556 = vmatprep.subr.bf16.mxu1 %v2488_v54 }
 0x625   : > { %2514 = vmatpush1.bf16.msra.mxu0 %v2485_v51  ;;  %2557 = vmatpush1.bf16.msra.mxu1 %v2487_v52  ;;  %v2619_v27 = vrot.slane %v2614_v26, %v2618_v25 }
 0x628   : > { %2913 = vmatmul.mubr.msk.bf16.vlgmr.msra.gmra.mrb[112].mxu0 %vm2352_vm2, %v3001_v55  ;;  %2914 = vmatmul.mubr.msk.bf16.vlgmr.msra.gmra.mrb[112].mxu1 %vm2352_vm2, %v3001_v55 }
 0x629   : > { %2655 = vmatprep.mubr.bf16.mxu0 %v3082_v7  ;;  %2696 = vmatprep.mubr.bf16.mxu1 %v3082_v7 }
 0x6fb   : > { %v2545_v58 = vpop.f32.mrb[112].mxu0  ;;  %v2588_v59 = vpop.f32.mrb[112].mxu1 }
 0x6fc   : > { %v2546_v60 = vadd.f32 %v2545_v58, %v2496_v57  ;;  %v2589_v61 = vadd.f32 %v2588_v59, %v2496_v57  ;;  %v2547_v62 = vpop.f32.mrb[113].mxu0  ;;  %v2590_v63 = vpop.f32.mrb[113].mxu1 }
 0x6fd   : > { %v2548_v0 = vadd.f32 %v2547_v62, %v2496_v57  ;;  %v2591_v1 = vadd.f32 %v2590_v63, %v2496_v57  ;;  %v2549_v2 = vpop.f32.mrb[114].mxu0  ;;  %v2592_v3 = vpop.f32.mrb[114].mxu1 }
 0x6fe   : > { %v2550_v4 = vadd.f32 %v2549_v2, %v2501_v56  ;;  %v2593_v5 = vadd.f32 %v2592_v3, %v2501_v56  ;;  %v2551_v6 = vpop.f32.mrb[115].mxu0  ;;  %v2594_v8 = vpop.f32.mrb[115].mxu1  ;;  %v2597_v11 = vmax.f32 %v2546_v60, 0.0  ;;  %v2599_v7 = vmax.f32 %v2589_v61, 0.0 }
 0x6ff   : > { %v2552_v9 = vadd.f32 %v2551_v6, %v2501_v56  ;;  %v2595_v10 = vadd.f32 %v2594_v8, %v2501_v56  ;;  %v2598_v14 = vmax.f32 %v2548_v0, 0.0  ;;  %v2600_v15 = vmax.f32 %v2591_v1, 0.0 }
 0x700   : > { %v2601_v12 = vmax.f32 %v2550_v4, 0.0  ;;  %v2603_v13 = vmax.f32 %v2593_v5, 0.0  ;;  %v3083_v56 = vmov 1966171168  }
 0x701   : > { %v2602_v16 = vmax.f32 %v2552_v9, 0.0  ;;  %v2604_v17 = vmax.f32 %v2595_v10, 0.0  ;;  %v2732_v57 = vunpack.c.l.s4 %v3083_v56 }
 0x702   : > { %v2605_v18 = vpack.c.bf16 %v2601_v12, %v2597_v11  ;;  %v2607_v19 = vpack.c.bf16 %v2603_v13, %v2599_v7 }
 0x703   : > { %v2606_v20 = vpack.c.bf16 %v2602_v16, %v2598_v14  ;;  %v2608_v21 = vpack.c.bf16 %v2604_v17, %v2600_v15  ;;  %v2733_v58 = vunpack.c.0.s8 %v2732_v57 }
 0x705   : > { %2623 = vmatprep.subr.bf16.mxu0 %v2606_v20  ;;  %2664 = vmatprep.subr.bf16.mxu1 %v2608_v21  ;;  %v2736_v61 = vsub.s32 %v2733_v58, %v2617_v24 }
 0x706   : > { %2624 = vmatpush1.bf16.msra.mxu0 %v2605_v18  ;;  %2665 = vmatpush1.bf16.msra.mxu1 %v2607_v19 }
 0x709   : > { %2915 = vmatmul.mubr.msk.bf16.vlgmr.msra.gmra.mrb[116].mxu0 %vm754_vm0, %v2609_v22  ;;  %2916 = vmatmul.mubr.msk.bf16.vlgmr.msra.gmra.mrb[116].mxu1 %vm754_vm0, %v2609_v22 }
 0x7dc   : > { %v2657_v28 = vpop.f32.mrb[116].mxu0  ;;  %v2698_v29 = vpop.f32.mrb[116].mxu1 }
 0x7dd   : > { %v2658_v30 = vadd.f32 %v2657_v28, %v2619_v27  ;;  %v2699_v31 = vadd.f32 %v2698_v29, %v2619_v27  ;;  %v2659_v32 = vpop.f32.mrb[117].mxu0  ;;  %v2700_v33 = vpop.f32.mrb[117].mxu1 }
 0x7de   : > { %v2660_v34 = vadd.f32 %v2659_v32, %v2619_v27  ;;  %v2701_v35 = vadd.f32 %v2700_v33, %v2619_v27  ;;  %v2661_v36 = vpop.f32.mrb[118].mxu0  ;;  %v2702_v37 = vpop.f32.mrb[118].mxu1 }
 0x7df   : > { %v2705_v38 = vsub.f32 0.0, %v2658_v30  ;;  %v2707_v39 = vsub.f32 0.0, %v2699_v31  ;;  %v2662_v40 = vpop.f32.mrb[119].mxu0  ;;  %v2703_v41 = vpop.f32.mrb[119].mxu1 }
 0x7e0   : > { %v2706_v42 = vsub.f32 0.0, %v2660_v34  ;;  %v2708_v43 = vsub.f32 0.0, %v2701_v35 }
 0x7e1   : > { %v2709_v44 = vmul.f32 1.442695, %v2705_v38  ;;  %v2713_v45 = vmul.f32 1.442695, %v2707_v39 }
 0x7e2   : > { %v2711_v46 = vmul.f32 1.442695, %v2706_v42  ;;  %v2715_v47 = vmul.f32 1.442695, %v2708_v43 }
 0x7e3   : > { %3002 = vpow2.f32 %v2709_v44 }
 0x7e4   : > { %3004 = vpow2.f32 %v2713_v45 }
 0x7e5   : > { %3006 = vpow2.f32 %v2711_v46 }
 0x7e6   : > { %3008 = vpow2.f32 %v2715_v47 }
 0x7ed   : > { %v3003_v48 = vpop.eup %3002 }
 0x7ee   : > { %v3005_v49 = vpop.eup %3004  ;;  %v2717_v50 = vadd.f32 1.0, %v3003_v48 }
 0x7ef   : > { %v3007_v51 = vpop.eup %3006  ;;  %v2719_v52 = vadd.f32 1.0, %v3005_v49 }
 0x7f0   : > { %v3009_v53 = vpop.eup %3008  ;;  %3010 = vrcp.f32 %v2717_v50  ;;  %v2718_v54 = vadd.f32 1.0, %v3007_v51 }
 0x7f1   : > { %3012 = vrcp.f32 %v2719_v52  ;;  %v2720_v55 = vadd.f32 1.0, %v3009_v53 }
 0x7f2   : > { %3014 = vrcp.f32 %v2718_v54 }
 0x7f3   : > { %3016 = vrcp.f32 %v2720_v55 }
 0x7fa   : > { %v3011_v59 = vpop.eup %3010 }
 0x7fb   : > { %v3013_v60 = vpop.eup %3012 }
 0x7fc   : > { %v3015_v62 = vpop.eup %3014 }
 0x7fd   : > { %v3017_v63 = vpop.eup %3016  ;;  %v2729_v0 = vcombine.low %v3011_v59, %v3015_v62 }
 0x7fe   : > { %v2730_v1 = vcombine.low %v3013_v60, %v3017_v63 }
 0x7ff   : > { %v2737_v2 = vrot.slane %v2729_v0, %v2736_v61 }
 0x800   : > { %v2744_v3 = vrot.slane %v2730_v1, %v2736_v61 }
 0x802   : > { %v2745_v4 = vcombine.low %v2737_v2, %v2744_v3 }
 0x804   : > { %v2752_v5 = vrot.slane %v2745_v4, %v2736_v61 }
 0x806   : > { %2758 = vst.msk [vmem:[%s574_s24] sm:$0xf] %vm2756_vm3, %v2752_v5 }
 0x807   : > { %3031 = shalt.err (!%p3028_p5)
}
 0x808   : > { %s3032_s18 = scalar_lea.hbm %s3606_s27, 64  ;;  %s3036_s16 = scalar_lea.hbm %s3667_s17, 128 }
 0x809   : > { %p3033_p7 = scmp.ne.s32.totalorder %s3606_s27, %s3032_s18  ;;  %p3037_p12 = scmp.lt.u32.totalorder %s3606_s27, %s3667_s17 }
 0x80a   : > { %p3038_p13 = scmp.lt.u32.totalorder %s3036_s16, %s3032_s18  ;;  %p3040_p1 = scmp.lt.u32.totalorder %s3032_s18, %s3606_s27 }
 0x80b   : > { %p3034_p10 = pnand %p3033_p7, %p3216_p6 }
 0x80c   : > { %p3039_p0 = por %p3038_p13, %p3037_p12 }
 0x80d   : > { %p3035_p11 = pneg %p3034_p10 }
 0x80e   : > { %p3041_p2 = por %p3040_p1, %p3039_p0 }
 0x810   : > { %p3042_p3 = pnand %p3041_p2, %p3035_p11 }
 0x812   : > { %3045 = shalt.err (!%p3042_p3)
}
 0x813   : > { %2924 = dma.vmem_to_hbm [thread:$0]  (%p3216_p6), %s3608_s1, 64, %s3606_s27, %s2760_s19  }
 0x814 PF: > { %s2786_s3 = sand.u32 1, %s3068_s26   ;;  %p2927_p4 = pnand %p2841_p9, %p3220_p8 }
 0x815   : > { %s2787_s0 = scalar_lea.sflag [#allocation5], %s2786_s3 }
 0x816   : > { %3063 = dma.done.wait (!%p2927_p4), %s2787_s0, 64  }
 0x817   : > { %3065 = vsyncadd (!%p2927_p4), %s2787_s0, 4294967232  ;;  %s3686_s26 = sld [smem:[#allocation7_spill]]  ;;  %s3687_s27 = sld [smem:[#allocation8_spill]] }
 0x818   : > { %s3688_s28 = sld [smem:[#allocation9_spill]]  ;;  %p29_p5 = scmp.ge.s32.totalorder %s3201_s30, 4  }
 0x819   : > { %s3689_s29 = smov %s3201_s30 }
 0x81a   :  { %31 = sbr.rel (!%p29_p5) target bundleno = 8 (0x8), region = 151 }
 0x821   :  { %2792 = vsyncpa [#allocation5], 1 }
 0x822   :  { %2794 = vsyncpa [#allocation5 + $0x1], 1 }

</bundles_post_ra>
